<compile_context>
chip_gen: v6e
topology: v6e:2x2x1
jax: 0.10.0
libtpu: 0.0.40
codegen_flags: <defaults>
</compile_context>

<pallas_src>
import math
import jax
import jax.numpy as jnp
from jax.experimental import pallas as pl
from jax.experimental.pallas import tpu as pltpu

# ----------------------------- config (small synthetic BERT) ----------------
VOCAB = 100
B, S, H = 2, 8, 32          # batch, seq-len, hidden
NH, HD = 2, 16              # num heads, head dim (NH * HD == H)
I = 64                      # intermediate (FFN) dim
NLAYERS = 2                 # number of encoder layers


# ----------------------------- in-kernel helpers ----------------------------
def _layer_norm(x, gamma, beta, eps=1e-12):
    mean = jnp.mean(x, axis=-1, keepdims=True)
    var = jnp.mean((x - mean) ** 2, axis=-1, keepdims=True)
    return (x - mean) * jax.lax.rsqrt(var + eps) * gamma + beta


def _gelu(x):
    # TODO(synk): HF BERT default is exact erf-GELU; using tanh approximation.
    c = math.sqrt(2.0 / math.pi)
    return 0.5 * x * (1.0 + jnp.tanh(c * (x + 0.044715 * x * x * x)))


# ----------------------------- fused Pallas kernel ---------------------------
def fused_text_kernel(*refs):
    # ---- parse refs: inputs, outputs, scratch (all static) ----
    ids_ref, bias_ref, wtab_ref, pte_ref, eg_ref, eb_ref = refs[:6]
    layer_refs = refs[6:6 + 12 * NLAYERS]
    pw_ref, pb_ref = refs[6 + 12 * NLAYERS: 8 + 12 * NLAYERS]
    hidden_out_ref, pooled_out_ref = refs[8 + 12 * NLAYERS: 10 + 12 * NLAYERS]
    ctx_ref = refs[10 + 12 * NLAYERS]          # VMEM scratch (B*S, H) f32

    BS = B * S

    # ---- embedding lookup as one-hot matmul (gather stays on-chip) ----
    ids = ids_ref[...]                                          # (BS, 1) int32
    vocab_iota = jax.lax.broadcasted_iota(jnp.int32, (BS, VOCAB), 1)
    onehot = (vocab_iota == ids).astype(jnp.float32)            # (BS, VOCAB)
    we = jnp.dot(onehot, wtab_ref[...], preferred_element_type=jnp.float32)
    x = _layer_norm(we + pte_ref[...], eg_ref[...], eb_ref[...])  # (BS, H) f32

    bias_all = bias_ref[...]                                    # (B, S) f32
    scale = 1.0 / math.sqrt(HD)

    # ---- encoder layers (static Python loop, weights resident in VMEM) ----
    for l in range(NLAYERS):
        (wqkv, bqkv, wao, bao, g1, b1,
         wi, bi, wfo, bfo, g2, b2) = layer_refs[12 * l: 12 * (l + 1)]

        x_bf = x.astype(jnp.bfloat16)
        qkv = jnp.dot(x_bf, wqkv[...],
                      preferred_element_type=jnp.float32) + bqkv[...]
        qkv_bf = qkv.astype(jnp.bfloat16)
        q = qkv_bf[:, 0:H]
        k = qkv_bf[:, H:2 * H]
        v = qkv_bf[:, 2 * H:3 * H]

        # attention: static unroll over (batch, head); write each head's
        # context straight into a lane slice of the VMEM scratch.
        for b in range(B):
            bias_b = bias_all[b:b + 1, :]                       # (1, S)
            r0, r1 = b * S, (b + 1) * S
            for h in range(NH):
                c0, c1 = h * HD, (h + 1) * HD
                qh = q[r0:r1, c0:c1]
                kh = k[r0:r1, c0:c1]
                vh = v[r0:r1, c0:c1]
                s = jax.lax.dot_general(qh, kh, (((1,), (1,)), ((), ())),
                                        preferred_element_type=jnp.float32)
                s = s * scale + bias_b                          # (S, S)
                s = s - jnp.max(s, axis=-1, keepdims=True)
                p = jnp.exp(s)
                inv = pl.reciprocal(jnp.sum(p, axis=-1, keepdims=True),
                                    approx=True)
                p = (p * inv).astype(jnp.bfloat16)
                ctx_ref[r0:r1, c0:c1] = jnp.dot(
                    p, vh, preferred_element_type=jnp.float32)

        ctx_bf = ctx_ref[...].astype(jnp.bfloat16)
        attn_out = jnp.dot(ctx_bf, wao[...],
                           preferred_element_type=jnp.float32) + bao[...]
        x1 = _layer_norm(x + attn_out, g1[...], b1[...])

        x1_bf = x1.astype(jnp.bfloat16)
        inter = _gelu(jnp.dot(x1_bf, wi[...],
                              preferred_element_type=jnp.float32) + bi[...])
        ffn = jnp.dot(inter.astype(jnp.bfloat16), wfo[...],
                      preferred_element_type=jnp.float32) + bfo[...]
        x = _layer_norm(x1 + ffn, g2[...], b2[...])

    hidden_out_ref[...] = x                                     # (BS, H) f32

    # ---- pooler epilogue: tanh(dense(CLS rows)) on the resident hidden ----
    cls = jnp.concatenate([x[b * S: b * S + 1, :] for b in range(B)], axis=0)
    pooled = jnp.tanh(
        jnp.dot(cls.astype(jnp.bfloat16), pw_ref[...],
                preferred_element_type=jnp.float32) + pb_ref[...])
    pooled_out_ref[...] = pooled                                # (B, H) f32


# ----------------------------- parameters ------------------------------------
def init_params(key):
    def dense(k, fan_in, fan_out):
        w = (jax.random.normal(k, (fan_in, fan_out), jnp.float32)
             * 0.02).astype(jnp.bfloat16)                       # bf16 weights
        b = jnp.zeros((1, fan_out), jnp.float32)                # f32 biases
        return w, b

    keys = jax.random.split(key, 4 + NLAYERS)
    params = {
        "word_emb": jax.random.normal(keys[0], (VOCAB, H), jnp.float32) * 0.02,
        "pos_emb": jax.random.normal(keys[1], (S, H), jnp.float32) * 0.02,
        "type_emb": jax.random.normal(keys[2], (2, H), jnp.float32) * 0.02,
        "emb_gamma": jnp.ones((1, H), jnp.float32),
        "emb_beta": jnp.zeros((1, H), jnp.float32),
    }
    pw, pb = dense(keys[3], H, H)
    params["pool_w"], params["pool_b"] = pw, pb

    layers = []
    for l in range(NLAYERS):
        lk = jax.random.split(keys[4 + l], 6)
        wq, _ = dense(lk[0], H, H)
        wk, _ = dense(lk[1], H, H)
        wv, _ = dense(lk[2], H, H)
        wqkv = jnp.concatenate([wq, wk, wv], axis=1)            # fused (H, 3H)
        bqkv = jnp.zeros((1, 3 * H), jnp.float32)
        wao, bao = dense(lk[3], H, H)
        wi, bi = dense(lk[4], H, I)
        wfo, bfo = dense(lk[5], I, H)
        g1 = jnp.ones((1, H), jnp.float32); b1 = jnp.zeros((1, H), jnp.float32)
        g2 = jnp.ones((1, H), jnp.float32); b2 = jnp.zeros((1, H), jnp.float32)
        layers.append((wqkv, bqkv, wao, bao, g1, b1,
                       wi, bi, wfo, bfo, g2, b2))
    params["layers"] = layers
    return params


# ----------------------------- TextModel.forward -----------------------------
@jax.jit
def text_model_forward(input_ids, attention_mask, params):
    """Returns (last_hidden_state [B,S,H], pooler_output [B,H])."""
    ids_flat = input_ids.reshape(B * S, 1).astype(jnp.int32)
    # additive attention-mask bias over the key axis, computed once.
    attn_bias = (1.0 - attention_mask.astype(jnp.float32)) * -10000.0   # (B, S)
    # positional + token-type (ids == 0) embeddings, tiled to (B*S, H).
    pte = jnp.tile(params["pos_emb"] + params["type_emb"][0][None, :], (B, 1))

    flat_layer_params = []
    for lp in params["layers"]:
        flat_layer_params.extend(lp)

    hidden_flat, pooled = pl.pallas_call(
        fused_text_kernel,
        out_shape=(jax.ShapeDtypeStruct((B * S, H), jnp.float32),
                   jax.ShapeDtypeStruct((B, H), jnp.float32)),
        scratch_shapes=[pltpu.VMEM((B * S, H), jnp.float32)],
    )(ids_flat, attn_bias, params["word_emb"], pte,
      params["emb_gamma"], params["emb_beta"],
      *flat_layer_params,
      params["pool_w"], params["pool_b"])

    return hidden_flat.reshape(B, S, H), pooled


# ----------------------------- main ------------------------------------------
if __name__ == "__main__":
    key = jax.random.PRNGKey(0)
    k_param, k_ids = jax.random.split(key)
    params = init_params(k_param)

    input_ids = jax.random.randint(k_ids, (B, S), 0, VOCAB, dtype=jnp.int32)
    attention_mask = jnp.ones((B, S), dtype=jnp.int32)
    attention_mask = attention_mask.at[1, S - 2:].set(0)     # pad last 2 tokens of batch 1

    # TODO(synk): dropout from the PyTorch module is omitted (inference mode).
    last_hidden_state, pooler_output = text_model_forward(
        input_ids, attention_mask, params)
    jax.block_until_ready((last_hidden_state, pooler_output))

    assert last_hidden_state.shape == (B, S, H)
    assert pooler_output.shape == (B, H)
    print("KERNEL_OK")
</pallas_src>

<mosaic_0001>
module attributes {stable_mosaic.version = 11 : i64} {
  func.func @fused_text_kernel(%arg0: memref<16x1xi32, #tpu.memory_space<vmem>>, %arg1: memref<2x8xf32, #tpu.memory_space<vmem>>, %arg2: memref<100x32xf32, #tpu.memory_space<vmem>>, %arg3: memref<16x32xf32, #tpu.memory_space<vmem>>, %arg4: memref<1x32xf32, #tpu.memory_space<vmem>>, %arg5: memref<1x32xf32, #tpu.memory_space<vmem>>, %arg6: memref<32x96xbf16, #tpu.memory_space<vmem>>, %arg7: memref<1x96xf32, #tpu.memory_space<vmem>>, %arg8: memref<32x32xbf16, #tpu.memory_space<vmem>>, %arg9: memref<1x32xf32, #tpu.memory_space<vmem>>, %arg10: memref<1x32xf32, #tpu.memory_space<vmem>>, %arg11: memref<1x32xf32, #tpu.memory_space<vmem>>, %arg12: memref<32x64xbf16, #tpu.memory_space<vmem>>, %arg13: memref<1x64xf32, #tpu.memory_space<vmem>>, %arg14: memref<64x32xbf16, #tpu.memory_space<vmem>>, %arg15: memref<1x32xf32, #tpu.memory_space<vmem>>, %arg16: memref<1x32xf32, #tpu.memory_space<vmem>>, %arg17: memref<1x32xf32, #tpu.memory_space<vmem>>, %arg18: memref<32x96xbf16, #tpu.memory_space<vmem>>, %arg19: memref<1x96xf32, #tpu.memory_space<vmem>>, %arg20: memref<32x32xbf16, #tpu.memory_space<vmem>>, %arg21: memref<1x32xf32, #tpu.memory_space<vmem>>, %arg22: memref<1x32xf32, #tpu.memory_space<vmem>>, %arg23: memref<1x32xf32, #tpu.memory_space<vmem>>, %arg24: memref<32x64xbf16, #tpu.memory_space<vmem>>, %arg25: memref<1x64xf32, #tpu.memory_space<vmem>>, %arg26: memref<64x32xbf16, #tpu.memory_space<vmem>>, %arg27: memref<1x32xf32, #tpu.memory_space<vmem>>, %arg28: memref<1x32xf32, #tpu.memory_space<vmem>>, %arg29: memref<1x32xf32, #tpu.memory_space<vmem>>, %arg30: memref<32x32xbf16, #tpu.memory_space<vmem>>, %arg31: memref<1x32xf32, #tpu.memory_space<vmem>>, %arg32: memref<16x32xf32, #tpu.memory_space<vmem>>, %arg33: memref<2x32xf32, #tpu.memory_space<vmem>>, %arg34: memref<16x32xf32, #tpu.memory_space<vmem>>) attributes {dimension_semantics = [], scalar_prefetch = 0 : i64, scratch_operands = 1 : i64, tpu.core_type = #tpu.core_type<tc>} {
    %c0 = arith.constant 0 : index
    %c0_0 = arith.constant 0 : index
    %0 = vector.load %arg0[%c0, %c0_0] : memref<16x1xi32, #tpu.memory_space<vmem>>, vector<16x1xi32>
    %1 = tpu.iota {dimensions = array<i32: 1>} : vector<16x100xi32>
    %2 = vector.broadcast %0 : vector<16x1xi32> to vector<16x100xi32>
    %3 = arith.cmpi eq, %1, %2 : vector<16x100xi32>
    %4 = arith.extui %3 : vector<16x100xi1> to vector<16x100xi32>
    %5 = arith.sitofp %4 : vector<16x100xi32> to vector<16x100xf32>
    %c0_1 = arith.constant 0 : index
    %c0_2 = arith.constant 0 : index
    %6 = vector.load %arg2[%c0_1, %c0_2] : memref<100x32xf32, #tpu.memory_space<vmem>>, vector<100x32xf32>
    %cst = arith.constant dense<0.000000e+00> : vector<16x32xf32>
    %7 = tpu.matmul %5, %6, %cst {dimension_numbers = #tpu.dot_dimension_numbers<[1], [0], [0], [1], [0, 0, 1, 1], [], []>} : vector<16x100xf32>, vector<100x32xf32>, vector<16x32xf32> -> vector<16x32xf32>
    %c0_3 = arith.constant 0 : index
    %c0_4 = arith.constant 0 : index
    %8 = vector.load %arg3[%c0_3, %c0_4] : memref<16x32xf32, #tpu.memory_space<vmem>>, vector<16x32xf32>
    %9 = arith.addf %7, %8 : vector<16x32xf32>
    %c0_5 = arith.constant 0 : index
    %c0_6 = arith.constant 0 : index
    %10 = vector.load %arg4[%c0_5, %c0_6] : memref<1x32xf32, #tpu.memory_space<vmem>>, vector<1x32xf32>
    %c0_7 = arith.constant 0 : index
    %c0_8 = arith.constant 0 : index
    %11 = vector.load %arg5[%c0_7, %c0_8] : memref<1x32xf32, #tpu.memory_space<vmem>>, vector<1x32xf32>
    %cst_9 = arith.constant dense<0.000000e+00> : vector<16xf32>
    %12 = vector.multi_reduction <add>, %9, %cst_9 [1] : vector<16x32xf32> to vector<16xf32>
    %13 = vector.shape_cast %12 : vector<16xf32> to vector<16x1xf32>
    %cst_10 = arith.constant 3.200000e+01 : f32
    %14 = vector.broadcast %cst_10 : f32 to vector<16x1xf32>
    %15 = arith.divf %13, %14 : vector<16x1xf32>
    %16 = vector.broadcast %15 : vector<16x1xf32> to vector<16x32xf32>
    %17 = arith.subf %9, %16 : vector<16x32xf32>
    %18 = arith.mulf %17, %17 : vector<16x32xf32>
    %cst_11 = arith.constant dense<0.000000e+00> : vector<16xf32>
    %19 = vector.multi_reduction <add>, %18, %cst_11 [1] : vector<16x32xf32> to vector<16xf32>
    %20 = vector.shape_cast %19 : vector<16xf32> to vector<16x1xf32>
    %cst_12 = arith.constant 3.200000e+01 : f32
    %21 = vector.broadcast %cst_12 : f32 to vector<16x1xf32>
    %22 = arith.divf %20, %21 : vector<16x1xf32>
    %23 = vector.broadcast %15 : vector<16x1xf32> to vector<16x32xf32>
    %24 = arith.subf %9, %23 : vector<16x32xf32>
    %cst_13 = arith.constant 9.99999996E-13 : f32
    %25 = vector.broadcast %cst_13 : f32 to vector<16x1xf32>
    %26 = arith.addf %22, %25 : vector<16x1xf32>
    %27 = math.rsqrt %26 : vector<16x1xf32>
    %28 = vector.broadcast %27 : vector<16x1xf32> to vector<16x32xf32>
    %29 = arith.mulf %24, %28 : vector<16x32xf32>
    %30 = vector.broadcast %10 : vector<1x32xf32> to vector<16x32xf32>
    %31 = arith.mulf %29, %30 : vector<16x32xf32>
    %32 = vector.broadcast %11 : vector<1x32xf32> to vector<16x32xf32>
    %33 = arith.addf %31, %32 : vector<16x32xf32>
    %c0_14 = arith.constant 0 : index
    %c0_15 = arith.constant 0 : index
    %34 = vector.load %arg1[%c0_14, %c0_15] : memref<2x8xf32, #tpu.memory_space<vmem>>, vector<2x8xf32>
    %35 = arith.truncf %33 : vector<16x32xf32> to vector<16x32xbf16>
    %c0_16 = arith.constant 0 : index
    %c0_17 = arith.constant 0 : index
    %36 = vector.load %arg6[%c0_16, %c0_17] : memref<32x96xbf16, #tpu.memory_space<vmem>>, vector<32x96xbf16>
    %cst_18 = arith.constant dense<0.000000e+00> : vector<16x96xf32>
    %37 = tpu.matmul %35, %36, %cst_18 {dimension_numbers = #tpu.dot_dimension_numbers<[1], [0], [0], [1], [0, 0, 1, 1], [], []>} : vector<16x32xbf16>, vector<32x96xbf16>, vector<16x96xf32> -> vector<16x96xf32>
    %c0_19 = arith.constant 0 : index
    %c0_20 = arith.constant 0 : index
    %38 = vector.load %arg7[%c0_19, %c0_20] : memref<1x96xf32, #tpu.memory_space<vmem>>, vector<1x96xf32>
    %39 = vector.broadcast %38 : vector<1x96xf32> to vector<16x96xf32>
    %40 = arith.addf %37, %39 : vector<16x96xf32>
    %41 = arith.truncf %40 : vector<16x96xf32> to vector<16x96xbf16>
    %42 = vector.extract_strided_slice %41 {offsets = [0, 0], sizes = [16, 32], strides = [1, 1]} : vector<16x96xbf16> to vector<16x32xbf16>
    %43 = vector.extract_strided_slice %41 {offsets = [0, 32], sizes = [16, 32], strides = [1, 1]} : vector<16x96xbf16> to vector<16x32xbf16>
    %44 = vector.extract_strided_slice %41 {offsets = [0, 64], sizes = [16, 32], strides = [1, 1]} : vector<16x96xbf16> to vector<16x32xbf16>
    %45 = vector.extract_strided_slice %34 {offsets = [0, 0], sizes = [1, 8], strides = [1, 1]} : vector<2x8xf32> to vector<1x8xf32>
    %46 = vector.extract_strided_slice %42 {offsets = [0, 0], sizes = [8, 16], strides = [1, 1]} : vector<16x32xbf16> to vector<8x16xbf16>
    %47 = vector.extract_strided_slice %43 {offsets = [0, 0], sizes = [8, 16], strides = [1, 1]} : vector<16x32xbf16> to vector<8x16xbf16>
    %48 = vector.extract_strided_slice %44 {offsets = [0, 0], sizes = [8, 16], strides = [1, 1]} : vector<16x32xbf16> to vector<8x16xbf16>
    %cst_21 = arith.constant dense<0.000000e+00> : vector<8x8xf32>
    %49 = tpu.matmul %46, %47, %cst_21 {dimension_numbers = #tpu.dot_dimension_numbers<[1], [1], [0], [0], [0, 0, 1, 0], [], []>} : vector<8x16xbf16>, vector<8x16xbf16>, vector<8x8xf32> -> vector<8x8xf32>
    %cst_22 = arith.constant 2.500000e-01 : f32
    %50 = vector.broadcast %cst_22 : f32 to vector<8x8xf32>
    %51 = arith.mulf %49, %50 : vector<8x8xf32>
    %52 = vector.broadcast %45 : vector<1x8xf32> to vector<8x8xf32>
    %53 = arith.addf %51, %52 : vector<8x8xf32>
    %cst_23 = arith.constant dense<0xFF800000> : vector<8xf32>
    %54 = vector.multi_reduction <maximumf>, %53, %cst_23 [1] : vector<8x8xf32> to vector<8xf32>
    %55 = vector.shape_cast %54 : vector<8xf32> to vector<8x1xf32>
    %56 = vector.broadcast %55 : vector<8x1xf32> to vector<8x8xf32>
    %57 = arith.subf %53, %56 : vector<8x8xf32>
    %58 = math.exp %57 : vector<8x8xf32>
    %cst_24 = arith.constant dense<0.000000e+00> : vector<8xf32>
    %59 = vector.multi_reduction <add>, %58, %cst_24 [1] : vector<8x8xf32> to vector<8xf32>
    %60 = vector.shape_cast %59 : vector<8xf32> to vector<8x1xf32>
    %61 = tpu.reciprocal %60 {approx = true} : vector<8x1xf32> -> vector<8x1xf32>
    %62 = vector.broadcast %61 : vector<8x1xf32> to vector<8x8xf32>
    %63 = arith.mulf %58, %62 : vector<8x8xf32>
    %64 = arith.truncf %63 : vector<8x8xf32> to vector<8x8xbf16>
    %cst_25 = arith.constant dense<0.000000e+00> : vector<8x16xf32>
    %65 = tpu.matmul %64, %48, %cst_25 {dimension_numbers = #tpu.dot_dimension_numbers<[1], [0], [0], [1], [0, 0, 1, 1], [], []>} : vector<8x8xbf16>, vector<8x16xbf16>, vector<8x16xf32> -> vector<8x16xf32>
    %c0_26 = arith.constant 0 : index
    %c0_27 = arith.constant 0 : index
    %66 = vector.load %arg34[%c0_26, %c0_27] : memref<16x32xf32, #tpu.memory_space<vmem>>, vector<8x16xf32>
    tpu.vector_store %arg34[%c0_26, %c0_27], %65 {strides = array<i32>} : memref<16x32xf32, #tpu.memory_space<vmem>>, vector<8x16xf32>,
    %67 = vector.extract_strided_slice %42 {offsets = [0, 16], sizes = [8, 16], strides = [1, 1]} : vector<16x32xbf16> to vector<8x16xbf16>
    %68 = vector.extract_strided_slice %43 {offsets = [0, 16], sizes = [8, 16], strides = [1, 1]} : vector<16x32xbf16> to vector<8x16xbf16>
    %69 = vector.extract_strided_slice %44 {offsets = [0, 16], sizes = [8, 16], strides = [1, 1]} : vector<16x32xbf16> to vector<8x16xbf16>
    %cst_28 = arith.constant dense<0.000000e+00> : vector<8x8xf32>
    %70 = tpu.matmul %67, %68, %cst_28 {dimension_numbers = #tpu.dot_dimension_numbers<[1], [1], [0], [0], [0, 0, 1, 0], [], []>} : vector<8x16xbf16>, vector<8x16xbf16>, vector<8x8xf32> -> vector<8x8xf32>
    %cst_29 = arith.constant 2.500000e-01 : f32
    %71 = vector.broadcast %cst_29 : f32 to vector<8x8xf32>
    %72 = arith.mulf %70, %71 : vector<8x8xf32>
    %73 = vector.broadcast %45 : vector<1x8xf32> to vector<8x8xf32>
    %74 = arith.addf %72, %73 : vector<8x8xf32>
    %cst_30 = arith.constant dense<0xFF800000> : vector<8xf32>
    %75 = vector.multi_reduction <maximumf>, %74, %cst_30 [1] : vector<8x8xf32> to vector<8xf32>
    %76 = vector.shape_cast %75 : vector<8xf32> to vector<8x1xf32>
    %77 = vector.broadcast %76 : vector<8x1xf32> to vector<8x8xf32>
    %78 = arith.subf %74, %77 : vector<8x8xf32>
    %79 = math.exp %78 : vector<8x8xf32>
    %cst_31 = arith.constant dense<0.000000e+00> : vector<8xf32>
    %80 = vector.multi_reduction <add>, %79, %cst_31 [1] : vector<8x8xf32> to vector<8xf32>
    %81 = vector.shape_cast %80 : vector<8xf32> to vector<8x1xf32>
    %82 = tpu.reciprocal %81 {approx = true} : vector<8x1xf32> -> vector<8x1xf32>
    %83 = vector.broadcast %82 : vector<8x1xf32> to vector<8x8xf32>
    %84 = arith.mulf %79, %83 : vector<8x8xf32>
    %85 = arith.truncf %84 : vector<8x8xf32> to vector<8x8xbf16>
    %cst_32 = arith.constant dense<0.000000e+00> : vector<8x16xf32>
    %86 = tpu.matmul %85, %69, %cst_32 {dimension_numbers = #tpu.dot_dimension_numbers<[1], [0], [0], [1], [0, 0, 1, 1], [], []>} : vector<8x8xbf16>, vector<8x16xbf16>, vector<8x16xf32> -> vector<8x16xf32>
    %c0_33 = arith.constant 0 : index
    %c16 = arith.constant 16 : index
    %87 = vector.load %arg34[%c0_33, %c16] : memref<16x32xf32, #tpu.memory_space<vmem>>, vector<8x16xf32>
    tpu.vector_store %arg34[%c0_33, %c16], %86 {strides = array<i32>} : memref<16x32xf32, #tpu.memory_space<vmem>>, vector<8x16xf32>,
    %88 = vector.extract_strided_slice %34 {offsets = [1, 0], sizes = [1, 8], strides = [1, 1]} : vector<2x8xf32> to vector<1x8xf32>
    %89 = vector.extract_strided_slice %42 {offsets = [8, 0], sizes = [8, 16], strides = [1, 1]} : vector<16x32xbf16> to vector<8x16xbf16>
    %90 = vector.extract_strided_slice %43 {offsets = [8, 0], sizes = [8, 16], strides = [1, 1]} : vector<16x32xbf16> to vector<8x16xbf16>
    %91 = vector.extract_strided_slice %44 {offsets = [8, 0], sizes = [8, 16], strides = [1, 1]} : vector<16x32xbf16> to vector<8x16xbf16>
    %cst_34 = arith.constant dense<0.000000e+00> : vector<8x8xf32>
    %92 = tpu.matmul %89, %90, %cst_34 {dimension_numbers = #tpu.dot_dimension_numbers<[1], [1], [0], [0], [0, 0, 1, 0], [], []>} : vector<8x16xbf16>, vector<8x16xbf16>, vector<8x8xf32> -> vector<8x8xf32>
    %cst_35 = arith.constant 2.500000e-01 : f32
    %93 = vector.broadcast %cst_35 : f32 to vector<8x8xf32>
    %94 = arith.mulf %92, %93 : vector<8x8xf32>
    %95 = vector.broadcast %88 : vector<1x8xf32> to vector<8x8xf32>
    %96 = arith.addf %94, %95 : vector<8x8xf32>
    %cst_36 = arith.constant dense<0xFF800000> : vector<8xf32>
    %97 = vector.multi_reduction <maximumf>, %96, %cst_36 [1] : vector<8x8xf32> to vector<8xf32>
    %98 = vector.shape_cast %97 : vector<8xf32> to vector<8x1xf32>
    %99 = vector.broadcast %98 : vector<8x1xf32> to vector<8x8xf32>
    %100 = arith.subf %96, %99 : vector<8x8xf32>
    %101 = math.exp %100 : vector<8x8xf32>
    %cst_37 = arith.constant dense<0.000000e+00> : vector<8xf32>
    %102 = vector.multi_reduction <add>, %101, %cst_37 [1] : vector<8x8xf32> to vector<8xf32>
    %103 = vector.shape_cast %102 : vector<8xf32> to vector<8x1xf32>
    %104 = tpu.reciprocal %103 {approx = true} : vector<8x1xf32> -> vector<8x1xf32>
    %105 = vector.broadcast %104 : vector<8x1xf32> to vector<8x8xf32>
    %106 = arith.mulf %101, %105 : vector<8x8xf32>
    %107 = arith.truncf %106 : vector<8x8xf32> to vector<8x8xbf16>
    %cst_38 = arith.constant dense<0.000000e+00> : vector<8x16xf32>
    %108 = tpu.matmul %107, %91, %cst_38 {dimension_numbers = #tpu.dot_dimension_numbers<[1], [0], [0], [1], [0, 0, 1, 1], [], []>} : vector<8x8xbf16>, vector<8x16xbf16>, vector<8x16xf32> -> vector<8x16xf32>
    %c8 = arith.constant 8 : index
    %c0_39 = arith.constant 0 : index
    %109 = vector.load %arg34[%c8, %c0_39] : memref<16x32xf32, #tpu.memory_space<vmem>>, vector<8x16xf32>
    tpu.vector_store %arg34[%c8, %c0_39], %108 {strides = array<i32>} : memref<16x32xf32, #tpu.memory_space<vmem>>, vector<8x16xf32>,
    %110 = vector.extract_strided_slice %42 {offsets = [8, 16], sizes = [8, 16], strides = [1, 1]} : vector<16x32xbf16> to vector<8x16xbf16>
    %111 = vector.extract_strided_slice %43 {offsets = [8, 16], sizes = [8, 16], strides = [1, 1]} : vector<16x32xbf16> to vector<8x16xbf16>
    %112 = vector.extract_strided_slice %44 {offsets = [8, 16], sizes = [8, 16], strides = [1, 1]} : vector<16x32xbf16> to vector<8x16xbf16>
    %cst_40 = arith.constant dense<0.000000e+00> : vector<8x8xf32>
    %113 = tpu.matmul %110, %111, %cst_40 {dimension_numbers = #tpu.dot_dimension_numbers<[1], [1], [0], [0], [0, 0, 1, 0], [], []>} : vector<8x16xbf16>, vector<8x16xbf16>, vector<8x8xf32> -> vector<8x8xf32>
    %cst_41 = arith.constant 2.500000e-01 : f32
    %114 = vector.broadcast %cst_41 : f32 to vector<8x8xf32>
    %115 = arith.mulf %113, %114 : vector<8x8xf32>
    %116 = vector.broadcast %88 : vector<1x8xf32> to vector<8x8xf32>
    %117 = arith.addf %115, %116 : vector<8x8xf32>
    %cst_42 = arith.constant dense<0xFF800000> : vector<8xf32>
    %118 = vector.multi_reduction <maximumf>, %117, %cst_42 [1] : vector<8x8xf32> to vector<8xf32>
    %119 = vector.shape_cast %118 : vector<8xf32> to vector<8x1xf32>
    %120 = vector.broadcast %119 : vector<8x1xf32> to vector<8x8xf32>
    %121 = arith.subf %117, %120 : vector<8x8xf32>
    %122 = math.exp %121 : vector<8x8xf32>
    %cst_43 = arith.constant dense<0.000000e+00> : vector<8xf32>
    %123 = vector.multi_reduction <add>, %122, %cst_43 [1] : vector<8x8xf32> to vector<8xf32>
    %124 = vector.shape_cast %123 : vector<8xf32> to vector<8x1xf32>
    %125 = tpu.reciprocal %124 {approx = true} : vector<8x1xf32> -> vector<8x1xf32>
    %126 = vector.broadcast %125 : vector<8x1xf32> to vector<8x8xf32>
    %127 = arith.mulf %122, %126 : vector<8x8xf32>
    %128 = arith.truncf %127 : vector<8x8xf32> to vector<8x8xbf16>
    %cst_44 = arith.constant dense<0.000000e+00> : vector<8x16xf32>
    %129 = tpu.matmul %128, %112, %cst_44 {dimension_numbers = #tpu.dot_dimension_numbers<[1], [0], [0], [1], [0, 0, 1, 1], [], []>} : vector<8x8xbf16>, vector<8x16xbf16>, vector<8x16xf32> -> vector<8x16xf32>
    %c8_45 = arith.constant 8 : index
    %c16_46 = arith.constant 16 : index
    %130 = vector.load %arg34[%c8_45, %c16_46] : memref<16x32xf32, #tpu.memory_space<vmem>>, vector<8x16xf32>
    tpu.vector_store %arg34[%c8_45, %c16_46], %129 {strides = array<i32>} : memref<16x32xf32, #tpu.memory_space<vmem>>, vector<8x16xf32>,
    %c0_47 = arith.constant 0 : index
    %c0_48 = arith.constant 0 : index
    %131 = vector.load %arg34[%c0_47, %c0_48] : memref<16x32xf32, #tpu.memory_space<vmem>>, vector<16x32xf32>
    %132 = arith.truncf %131 : vector<16x32xf32> to vector<16x32xbf16>
    %c0_49 = arith.constant 0 : index
    %c0_50 = arith.constant 0 : index
    %133 = vector.load %arg8[%c0_49, %c0_50] : memref<32x32xbf16, #tpu.memory_space<vmem>>, vector<32x32xbf16>
    %cst_51 = arith.constant dense<0.000000e+00> : vector<16x32xf32>
    %134 = tpu.matmul %132, %133, %cst_51 {dimension_numbers = #tpu.dot_dimension_numbers<[1], [0], [0], [1], [0, 0, 1, 1], [], []>} : vector<16x32xbf16>, vector<32x32xbf16>, vector<16x32xf32> -> vector<16x32xf32>
    %c0_52 = arith.constant 0 : index
    %c0_53 = arith.constant 0 : index
    %135 = vector.load %arg9[%c0_52, %c0_53] : memref<1x32xf32, #tpu.memory_space<vmem>>, vector<1x32xf32>
    %136 = vector.broadcast %135 : vector<1x32xf32> to vector<16x32xf32>
    %137 = arith.addf %134, %136 : vector<16x32xf32>
    %138 = arith.addf %33, %137 : vector<16x32xf32>
    %c0_54 = arith.constant 0 : index
    %c0_55 = arith.constant 0 : index
    %139 = vector.load %arg10[%c0_54, %c0_55] : memref<1x32xf32, #tpu.memory_space<vmem>>, vector<1x32xf32>
    %c0_56 = arith.constant 0 : index
    %c0_57 = arith.constant 0 : index
    %140 = vector.load %arg11[%c0_56, %c0_57] : memref<1x32xf32, #tpu.memory_space<vmem>>, vector<1x32xf32>
    %cst_58 = arith.constant dense<0.000000e+00> : vector<16xf32>
    %141 = vector.multi_reduction <add>, %138, %cst_58 [1] : vector<16x32xf32> to vector<16xf32>
    %142 = vector.shape_cast %141 : vector<16xf32> to vector<16x1xf32>
    %cst_59 = arith.constant 3.200000e+01 : f32
    %143 = vector.broadcast %cst_59 : f32 to vector<16x1xf32>
    %144 = arith.divf %142, %143 : vector<16x1xf32>
    %145 = vector.broadcast %144 : vector<16x1xf32> to vector<16x32xf32>
    %146 = arith.subf %138, %145 : vector<16x32xf32>
    %147 = arith.mulf %146, %146 : vector<16x32xf32>
    %cst_60 = arith.constant dense<0.000000e+00> : vector<16xf32>
    %148 = vector.multi_reduction <add>, %147, %cst_60 [1] : vector<16x32xf32> to vector<16xf32>
    %149 = vector.shape_cast %148 : vector<16xf32> to vector<16x1xf32>
    %cst_61 = arith.constant 3.200000e+01 : f32
    %150 = vector.broadcast %cst_61 : f32 to vector<16x1xf32>
    %151 = arith.divf %149, %150 : vector<16x1xf32>
    %152 = vector.broadcast %144 : vector<16x1xf32> to vector<16x32xf32>
    %153 = arith.subf %138, %152 : vector<16x32xf32>
    %cst_62 = arith.constant 9.99999996E-13 : f32
    %154 = vector.broadcast %cst_62 : f32 to vector<16x1xf32>
    %155 = arith.addf %151, %154 : vector<16x1xf32>
    %156 = math.rsqrt %155 : vector<16x1xf32>
    %157 = vector.broadcast %156 : vector<16x1xf32> to vector<16x32xf32>
    %158 = arith.mulf %153, %157 : vector<16x32xf32>
    %159 = vector.broadcast %139 : vector<1x32xf32> to vector<16x32xf32>
    %160 = arith.mulf %158, %159 : vector<16x32xf32>
    %161 = vector.broadcast %140 : vector<1x32xf32> to vector<16x32xf32>
    %162 = arith.addf %160, %161 : vector<16x32xf32>
    %163 = arith.truncf %162 : vector<16x32xf32> to vector<16x32xbf16>
    %c0_63 = arith.constant 0 : index
    %c0_64 = arith.constant 0 : index
    %164 = vector.load %arg12[%c0_63, %c0_64] : memref<32x64xbf16, #tpu.memory_space<vmem>>, vector<32x64xbf16>
    %cst_65 = arith.constant dense<0.000000e+00> : vector<16x64xf32>
    %165 = tpu.matmul %163, %164, %cst_65 {dimension_numbers = #tpu.dot_dimension_numbers<[1], [0], [0], [1], [0, 0, 1, 1], [], []>} : vector<16x32xbf16>, vector<32x64xbf16>, vector<16x64xf32> -> vector<16x64xf32>
    %c0_66 = arith.constant 0 : index
    %c0_67 = arith.constant 0 : index
    %166 = vector.load %arg13[%c0_66, %c0_67] : memref<1x64xf32, #tpu.memory_space<vmem>>, vector<1x64xf32>
    %167 = vector.broadcast %166 : vector<1x64xf32> to vector<16x64xf32>
    %168 = arith.addf %165, %167 : vector<16x64xf32>
    %cst_68 = arith.constant 5.000000e-01 : f32
    %169 = vector.broadcast %cst_68 : f32 to vector<16x64xf32>
    %170 = arith.mulf %169, %168 : vector<16x64xf32>
    %cst_69 = arith.constant 4.471500e-02 : f32
    %171 = vector.broadcast %cst_69 : f32 to vector<16x64xf32>
    %172 = arith.mulf %171, %168 : vector<16x64xf32>
    %173 = arith.mulf %172, %168 : vector<16x64xf32>
    %174 = arith.mulf %173, %168 : vector<16x64xf32>
    %175 = arith.addf %168, %174 : vector<16x64xf32>
    %cst_70 = arith.constant 0.797884583 : f32
    %176 = vector.broadcast %cst_70 : f32 to vector<16x64xf32>
    %177 = arith.mulf %176, %175 : vector<16x64xf32>
    %178 = math.tanh %177 : vector<16x64xf32>
    %cst_71 = arith.constant 1.000000e+00 : f32
    %179 = vector.broadcast %cst_71 : f32 to vector<16x64xf32>
    %180 = arith.addf %179, %178 : vector<16x64xf32>
    %181 = arith.mulf %170, %180 : vector<16x64xf32>
    %182 = arith.truncf %181 : vector<16x64xf32> to vector<16x64xbf16>
    %c0_72 = arith.constant 0 : index
    %c0_73 = arith.constant 0 : index
    %183 = vector.load %arg14[%c0_72, %c0_73] : memref<64x32xbf16, #tpu.memory_space<vmem>>, vector<64x32xbf16>
    %cst_74 = arith.constant dense<0.000000e+00> : vector<16x32xf32>
    %184 = tpu.matmul %182, %183, %cst_74 {dimension_numbers = #tpu.dot_dimension_numbers<[1], [0], [0], [1], [0, 0, 1, 1], [], []>} : vector<16x64xbf16>, vector<64x32xbf16>, vector<16x32xf32> -> vector<16x32xf32>
    %c0_75 = arith.constant 0 : index
    %c0_76 = arith.constant 0 : index
    %185 = vector.load %arg15[%c0_75, %c0_76] : memref<1x32xf32, #tpu.memory_space<vmem>>, vector<1x32xf32>
    %186 = vector.broadcast %185 : vector<1x32xf32> to vector<16x32xf32>
    %187 = arith.addf %184, %186 : vector<16x32xf32>
    %188 = arith.addf %162, %187 : vector<16x32xf32>
    %c0_77 = arith.constant 0 : index
    %c0_78 = arith.constant 0 : index
    %189 = vector.load %arg16[%c0_77, %c0_78] : memref<1x32xf32, #tpu.memory_space<vmem>>, vector<1x32xf32>
    %c0_79 = arith.constant 0 : index
    %c0_80 = arith.constant 0 : index
    %190 = vector.load %arg17[%c0_79, %c0_80] : memref<1x32xf32, #tpu.memory_space<vmem>>, vector<1x32xf32>
    %cst_81 = arith.constant dense<0.000000e+00> : vector<16xf32>
    %191 = vector.multi_reduction <add>, %188, %cst_81 [1] : vector<16x32xf32> to vector<16xf32>
    %192 = vector.shape_cast %191 : vector<16xf32> to vector<16x1xf32>
    %cst_82 = arith.constant 3.200000e+01 : f32
    %193 = vector.broadcast %cst_82 : f32 to vector<16x1xf32>
    %194 = arith.divf %192, %193 : vector<16x1xf32>
    %195 = vector.broadcast %194 : vector<16x1xf32> to vector<16x32xf32>
    %196 = arith.subf %188, %195 : vector<16x32xf32>
    %197 = arith.mulf %196, %196 : vector<16x32xf32>
    %cst_83 = arith.constant dense<0.000000e+00> : vector<16xf32>
    %198 = vector.multi_reduction <add>, %197, %cst_83 [1] : vector<16x32xf32> to vector<16xf32>
    %199 = vector.shape_cast %198 : vector<16xf32> to vector<16x1xf32>
    %cst_84 = arith.constant 3.200000e+01 : f32
    %200 = vector.broadcast %cst_84 : f32 to vector<16x1xf32>
    %201 = arith.divf %199, %200 : vector<16x1xf32>
    %202 = vector.broadcast %194 : vector<16x1xf32> to vector<16x32xf32>
    %203 = arith.subf %188, %202 : vector<16x32xf32>
    %cst_85 = arith.constant 9.99999996E-13 : f32
    %204 = vector.broadcast %cst_85 : f32 to vector<16x1xf32>
    %205 = arith.addf %201, %204 : vector<16x1xf32>
    %206 = math.rsqrt %205 : vector<16x1xf32>
    %207 = vector.broadcast %206 : vector<16x1xf32> to vector<16x32xf32>
    %208 = arith.mulf %203, %207 : vector<16x32xf32>
    %209 = vector.broadcast %189 : vector<1x32xf32> to vector<16x32xf32>
    %210 = arith.mulf %208, %209 : vector<16x32xf32>
    %211 = vector.broadcast %190 : vector<1x32xf32> to vector<16x32xf32>
    %212 = arith.addf %210, %211 : vector<16x32xf32>
    %213 = arith.truncf %212 : vector<16x32xf32> to vector<16x32xbf16>
    %c0_86 = arith.constant 0 : index
    %c0_87 = arith.constant 0 : index
    %214 = vector.load %arg18[%c0_86, %c0_87] : memref<32x96xbf16, #tpu.memory_space<vmem>>, vector<32x96xbf16>
    %cst_88 = arith.constant dense<0.000000e+00> : vector<16x96xf32>
    %215 = tpu.matmul %213, %214, %cst_88 {dimension_numbers = #tpu.dot_dimension_numbers<[1], [0], [0], [1], [0, 0, 1, 1], [], []>} : vector<16x32xbf16>, vector<32x96xbf16>, vector<16x96xf32> -> vector<16x96xf32>
    %c0_89 = arith.constant 0 : index
    %c0_90 = arith.constant 0 : index
    %216 = vector.load %arg19[%c0_89, %c0_90] : memref<1x96xf32, #tpu.memory_space<vmem>>, vector<1x96xf32>
    %217 = vector.broadcast %216 : vector<1x96xf32> to vector<16x96xf32>
    %218 = arith.addf %215, %217 : vector<16x96xf32>
    %219 = arith.truncf %218 : vector<16x96xf32> to vector<16x96xbf16>
    %220 = vector.extract_strided_slice %219 {offsets = [0, 0], sizes = [16, 32], strides = [1, 1]} : vector<16x96xbf16> to vector<16x32xbf16>
    %221 = vector.extract_strided_slice %219 {offsets = [0, 32], sizes = [16, 32], strides = [1, 1]} : vector<16x96xbf16> to vector<16x32xbf16>
    %222 = vector.extract_strided_slice %219 {offsets = [0, 64], sizes = [16, 32], strides = [1, 1]} : vector<16x96xbf16> to vector<16x32xbf16>
    %223 = vector.extract_strided_slice %34 {offsets = [0, 0], sizes = [1, 8], strides = [1, 1]} : vector<2x8xf32> to vector<1x8xf32>
    %224 = vector.extract_strided_slice %220 {offsets = [0, 0], sizes = [8, 16], strides = [1, 1]} : vector<16x32xbf16> to vector<8x16xbf16>
    %225 = vector.extract_strided_slice %221 {offsets = [0, 0], sizes = [8, 16], strides = [1, 1]} : vector<16x32xbf16> to vector<8x16xbf16>
    %226 = vector.extract_strided_slice %222 {offsets = [0, 0], sizes = [8, 16], strides = [1, 1]} : vector<16x32xbf16> to vector<8x16xbf16>
    %cst_91 = arith.constant dense<0.000000e+00> : vector<8x8xf32>
    %227 = tpu.matmul %224, %225, %cst_91 {dimension_numbers = #tpu.dot_dimension_numbers<[1], [1], [0], [0], [0, 0, 1, 0], [], []>} : vector<8x16xbf16>, vector<8x16xbf16>, vector<8x8xf32> -> vector<8x8xf32>
    %cst_92 = arith.constant 2.500000e-01 : f32
    %228 = vector.broadcast %cst_92 : f32 to vector<8x8xf32>
    %229 = arith.mulf %227, %228 : vector<8x8xf32>
    %230 = vector.broadcast %223 : vector<1x8xf32> to vector<8x8xf32>
    %231 = arith.addf %229, %230 : vector<8x8xf32>
    %cst_93 = arith.constant dense<0xFF800000> : vector<8xf32>
    %232 = vector.multi_reduction <maximumf>, %231, %cst_93 [1] : vector<8x8xf32> to vector<8xf32>
    %233 = vector.shape_cast %232 : vector<8xf32> to vector<8x1xf32>
    %234 = vector.broadcast %233 : vector<8x1xf32> to vector<8x8xf32>
    %235 = arith.subf %231, %234 : vector<8x8xf32>
    %236 = math.exp %235 : vector<8x8xf32>
    %cst_94 = arith.constant dense<0.000000e+00> : vector<8xf32>
    %237 = vector.multi_reduction <add>, %236, %cst_94 [1] : vector<8x8xf32> to vector<8xf32>
    %238 = vector.shape_cast %237 : vector<8xf32> to vector<8x1xf32>
    %239 = tpu.reciprocal %238 {approx = true} : vector<8x1xf32> -> vector<8x1xf32>
    %240 = vector.broadcast %239 : vector<8x1xf32> to vector<8x8xf32>
    %241 = arith.mulf %236, %240 : vector<8x8xf32>
    %242 = arith.truncf %241 : vector<8x8xf32> to vector<8x8xbf16>
    %cst_95 = arith.constant dense<0.000000e+00> : vector<8x16xf32>
    %243 = tpu.matmul %242, %226, %cst_95 {dimension_numbers = #tpu.dot_dimension_numbers<[1], [0], [0], [1], [0, 0, 1, 1], [], []>} : vector<8x8xbf16>, vector<8x16xbf16>, vector<8x16xf32> -> vector<8x16xf32>
    %c0_96 = arith.constant 0 : index
    %c0_97 = arith.constant 0 : index
    %244 = vector.load %arg34[%c0_96, %c0_97] : memref<16x32xf32, #tpu.memory_space<vmem>>, vector<8x16xf32>
    tpu.vector_store %arg34[%c0_96, %c0_97], %243 {strides = array<i32>} : memref<16x32xf32, #tpu.memory_space<vmem>>, vector<8x16xf32>,
    %245 = vector.extract_strided_slice %220 {offsets = [0, 16], sizes = [8, 16], strides = [1, 1]} : vector<16x32xbf16> to vector<8x16xbf16>
    %246 = vector.extract_strided_slice %221 {offsets = [0, 16], sizes = [8, 16], strides = [1, 1]} : vector<16x32xbf16> to vector<8x16xbf16>
    %247 = vector.extract_strided_slice %222 {offsets = [0, 16], sizes = [8, 16], strides = [1, 1]} : vector<16x32xbf16> to vector<8x16xbf16>
    %cst_98 = arith.constant dense<0.000000e+00> : vector<8x8xf32>
    %248 = tpu.matmul %245, %246, %cst_98 {dimension_numbers = #tpu.dot_dimension_numbers<[1], [1], [0], [0], [0, 0, 1, 0], [], []>} : vector<8x16xbf16>, vector<8x16xbf16>, vector<8x8xf32> -> vector<8x8xf32>
    %cst_99 = arith.constant 2.500000e-01 : f32
    %249 = vector.broadcast %cst_99 : f32 to vector<8x8xf32>
    %250 = arith.mulf %248, %249 : vector<8x8xf32>
    %251 = vector.broadcast %223 : vector<1x8xf32> to vector<8x8xf32>
    %252 = arith.addf %250, %251 : vector<8x8xf32>
    %cst_100 = arith.constant dense<0xFF800000> : vector<8xf32>
    %253 = vector.multi_reduction <maximumf>, %252, %cst_100 [1] : vector<8x8xf32> to vector<8xf32>
    %254 = vector.shape_cast %253 : vector<8xf32> to vector<8x1xf32>
    %255 = vector.broadcast %254 : vector<8x1xf32> to vector<8x8xf32>
    %256 = arith.subf %252, %255 : vector<8x8xf32>
    %257 = math.exp %256 : vector<8x8xf32>
    %cst_101 = arith.constant dense<0.000000e+00> : vector<8xf32>
    %258 = vector.multi_reduction <add>, %257, %cst_101 [1] : vector<8x8xf32> to vector<8xf32>
    %259 = vector.shape_cast %258 : vector<8xf32> to vector<8x1xf32>
    %260 = tpu.reciprocal %259 {approx = true} : vector<8x1xf32> -> vector<8x1xf32>
    %261 = vector.broadcast %260 : vector<8x1xf32> to vector<8x8xf32>
    %262 = arith.mulf %257, %261 : vector<8x8xf32>
    %263 = arith.truncf %262 : vector<8x8xf32> to vector<8x8xbf16>
    %cst_102 = arith.constant dense<0.000000e+00> : vector<8x16xf32>
    %264 = tpu.matmul %263, %247, %cst_102 {dimension_numbers = #tpu.dot_dimension_numbers<[1], [0], [0], [1], [0, 0, 1, 1], [], []>} : vector<8x8xbf16>, vector<8x16xbf16>, vector<8x16xf32> -> vector<8x16xf32>
    %c0_103 = arith.constant 0 : index
    %c16_104 = arith.constant 16 : index
    %265 = vector.load %arg34[%c0_103, %c16_104] : memref<16x32xf32, #tpu.memory_space<vmem>>, vector<8x16xf32>
    tpu.vector_store %arg34[%c0_103, %c16_104], %264 {strides = array<i32>} : memref<16x32xf32, #tpu.memory_space<vmem>>, vector<8x16xf32>,
    %266 = vector.extract_strided_slice %34 {offsets = [1, 0], sizes = [1, 8], strides = [1, 1]} : vector<2x8xf32> to vector<1x8xf32>
    %267 = vector.extract_strided_slice %220 {offsets = [8, 0], sizes = [8, 16], strides = [1, 1]} : vector<16x32xbf16> to vector<8x16xbf16>
    %268 = vector.extract_strided_slice %221 {offsets = [8, 0], sizes = [8, 16], strides = [1, 1]} : vector<16x32xbf16> to vector<8x16xbf16>
    %269 = vector.extract_strided_slice %222 {offsets = [8, 0], sizes = [8, 16], strides = [1, 1]} : vector<16x32xbf16> to vector<8x16xbf16>
    %cst_105 = arith.constant dense<0.000000e+00> : vector<8x8xf32>
    %270 = tpu.matmul %267, %268, %cst_105 {dimension_numbers = #tpu.dot_dimension_numbers<[1], [1], [0], [0], [0, 0, 1, 0], [], []>} : vector<8x16xbf16>, vector<8x16xbf16>, vector<8x8xf32> -> vector<8x8xf32>
    %cst_106 = arith.constant 2.500000e-01 : f32
    %271 = vector.broadcast %cst_106 : f32 to vector<8x8xf32>
    %272 = arith.mulf %270, %271 : vector<8x8xf32>
    %273 = vector.broadcast %266 : vector<1x8xf32> to vector<8x8xf32>
    %274 = arith.addf %272, %273 : vector<8x8xf32>
    %cst_107 = arith.constant dense<0xFF800000> : vector<8xf32>
    %275 = vector.multi_reduction <maximumf>, %274, %cst_107 [1] : vector<8x8xf32> to vector<8xf32>
    %276 = vector.shape_cast %275 : vector<8xf32> to vector<8x1xf32>
    %277 = vector.broadcast %276 : vector<8x1xf32> to vector<8x8xf32>
    %278 = arith.subf %274, %277 : vector<8x8xf32>
    %279 = math.exp %278 : vector<8x8xf32>
    %cst_108 = arith.constant dense<0.000000e+00> : vector<8xf32>
    %280 = vector.multi_reduction <add>, %279, %cst_108 [1] : vector<8x8xf32> to vector<8xf32>
    %281 = vector.shape_cast %280 : vector<8xf32> to vector<8x1xf32>
    %282 = tpu.reciprocal %281 {approx = true} : vector<8x1xf32> -> vector<8x1xf32>
    %283 = vector.broadcast %282 : vector<8x1xf32> to vector<8x8xf32>
    %284 = arith.mulf %279, %283 : vector<8x8xf32>
    %285 = arith.truncf %284 : vector<8x8xf32> to vector<8x8xbf16>
    %cst_109 = arith.constant dense<0.000000e+00> : vector<8x16xf32>
    %286 = tpu.matmul %285, %269, %cst_109 {dimension_numbers = #tpu.dot_dimension_numbers<[1], [0], [0], [1], [0, 0, 1, 1], [], []>} : vector<8x8xbf16>, vector<8x16xbf16>, vector<8x16xf32> -> vector<8x16xf32>
    %c8_110 = arith.constant 8 : index
    %c0_111 = arith.constant 0 : index
    %287 = vector.load %arg34[%c8_110, %c0_111] : memref<16x32xf32, #tpu.memory_space<vmem>>, vector<8x16xf32>
    tpu.vector_store %arg34[%c8_110, %c0_111], %286 {strides = array<i32>} : memref<16x32xf32, #tpu.memory_space<vmem>>, vector<8x16xf32>,
    %288 = vector.extract_strided_slice %220 {offsets = [8, 16], sizes = [8, 16], strides = [1, 1]} : vector<16x32xbf16> to vector<8x16xbf16>
    %289 = vector.extract_strided_slice %221 {offsets = [8, 16], sizes = [8, 16], strides = [1, 1]} : vector<16x32xbf16> to vector<8x16xbf16>
    %290 = vector.extract_strided_slice %222 {offsets = [8, 16], sizes = [8, 16], strides = [1, 1]} : vector<16x32xbf16> to vector<8x16xbf16>
    %cst_112 = arith.constant dense<0.000000e+00> : vector<8x8xf32>
    %291 = tpu.matmul %288, %289, %cst_112 {dimension_numbers = #tpu.dot_dimension_numbers<[1], [1], [0], [0], [0, 0, 1, 0], [], []>} : vector<8x16xbf16>, vector<8x16xbf16>, vector<8x8xf32> -> vector<8x8xf32>
    %cst_113 = arith.constant 2.500000e-01 : f32
    %292 = vector.broadcast %cst_113 : f32 to vector<8x8xf32>
    %293 = arith.mulf %291, %292 : vector<8x8xf32>
    %294 = vector.broadcast %266 : vector<1x8xf32> to vector<8x8xf32>
    %295 = arith.addf %293, %294 : vector<8x8xf32>
    %cst_114 = arith.constant dense<0xFF800000> : vector<8xf32>
    %296 = vector.multi_reduction <maximumf>, %295, %cst_114 [1] : vector<8x8xf32> to vector<8xf32>
    %297 = vector.shape_cast %296 : vector<8xf32> to vector<8x1xf32>
    %298 = vector.broadcast %297 : vector<8x1xf32> to vector<8x8xf32>
    %299 = arith.subf %295, %298 : vector<8x8xf32>
    %300 = math.exp %299 : vector<8x8xf32>
    %cst_115 = arith.constant dense<0.000000e+00> : vector<8xf32>
    %301 = vector.multi_reduction <add>, %300, %cst_115 [1] : vector<8x8xf32> to vector<8xf32>
    %302 = vector.shape_cast %301 : vector<8xf32> to vector<8x1xf32>
    %303 = tpu.reciprocal %302 {approx = true} : vector<8x1xf32> -> vector<8x1xf32>
    %304 = vector.broadcast %303 : vector<8x1xf32> to vector<8x8xf32>
    %305 = arith.mulf %300, %304 : vector<8x8xf32>
    %306 = arith.truncf %305 : vector<8x8xf32> to vector<8x8xbf16>
    %cst_116 = arith.constant dense<0.000000e+00> : vector<8x16xf32>
    %307 = tpu.matmul %306, %290, %cst_116 {dimension_numbers = #tpu.dot_dimension_numbers<[1], [0], [0], [1], [0, 0, 1, 1], [], []>} : vector<8x8xbf16>, vector<8x16xbf16>, vector<8x16xf32> -> vector<8x16xf32>
    %c8_117 = arith.constant 8 : index
    %c16_118 = arith.constant 16 : index
    %308 = vector.load %arg34[%c8_117, %c16_118] : memref<16x32xf32, #tpu.memory_space<vmem>>, vector<8x16xf32>
    tpu.vector_store %arg34[%c8_117, %c16_118], %307 {strides = array<i32>} : memref<16x32xf32, #tpu.memory_space<vmem>>, vector<8x16xf32>,
    %c0_119 = arith.constant 0 : index
    %c0_120 = arith.constant 0 : index
    %309 = vector.load %arg34[%c0_119, %c0_120] : memref<16x32xf32, #tpu.memory_space<vmem>>, vector<16x32xf32>
    %310 = arith.truncf %309 : vector<16x32xf32> to vector<16x32xbf16>
    %c0_121 = arith.constant 0 : index
    %c0_122 = arith.constant 0 : index
    %311 = vector.load %arg20[%c0_121, %c0_122] : memref<32x32xbf16, #tpu.memory_space<vmem>>, vector<32x32xbf16>
    %cst_123 = arith.constant dense<0.000000e+00> : vector<16x32xf32>
    %312 = tpu.matmul %310, %311, %cst_123 {dimension_numbers = #tpu.dot_dimension_numbers<[1], [0], [0], [1], [0, 0, 1, 1], [], []>} : vector<16x32xbf16>, vector<32x32xbf16>, vector<16x32xf32> -> vector<16x32xf32>
    %c0_124 = arith.constant 0 : index
    %c0_125 = arith.constant 0 : index
    %313 = vector.load %arg21[%c0_124, %c0_125] : memref<1x32xf32, #tpu.memory_space<vmem>>, vector<1x32xf32>
    %314 = vector.broadcast %313 : vector<1x32xf32> to vector<16x32xf32>
    %315 = arith.addf %312, %314 : vector<16x32xf32>
    %316 = arith.addf %212, %315 : vector<16x32xf32>
    %c0_126 = arith.constant 0 : index
    %c0_127 = arith.constant 0 : index
    %317 = vector.load %arg22[%c0_126, %c0_127] : memref<1x32xf32, #tpu.memory_space<vmem>>, vector<1x32xf32>
    %c0_128 = arith.constant 0 : index
    %c0_129 = arith.constant 0 : index
    %318 = vector.load %arg23[%c0_128, %c0_129] : memref<1x32xf32, #tpu.memory_space<vmem>>, vector<1x32xf32>
    %cst_130 = arith.constant dense<0.000000e+00> : vector<16xf32>
    %319 = vector.multi_reduction <add>, %316, %cst_130 [1] : vector<16x32xf32> to vector<16xf32>
    %320 = vector.shape_cast %319 : vector<16xf32> to vector<16x1xf32>
    %cst_131 = arith.constant 3.200000e+01 : f32
    %321 = vector.broadcast %cst_131 : f32 to vector<16x1xf32>
    %322 = arith.divf %320, %321 : vector<16x1xf32>
    %323 = vector.broadcast %322 : vector<16x1xf32> to vector<16x32xf32>
    %324 = arith.subf %316, %323 : vector<16x32xf32>
    %325 = arith.mulf %324, %324 : vector<16x32xf32>
    %cst_132 = arith.constant dense<0.000000e+00> : vector<16xf32>
    %326 = vector.multi_reduction <add>, %325, %cst_132 [1] : vector<16x32xf32> to vector<16xf32>
    %327 = vector.shape_cast %326 : vector<16xf32> to vector<16x1xf32>
    %cst_133 = arith.constant 3.200000e+01 : f32
    %328 = vector.broadcast %cst_133 : f32 to vector<16x1xf32>
    %329 = arith.divf %327, %328 : vector<16x1xf32>
    %330 = vector.broadcast %322 : vector<16x1xf32> to vector<16x32xf32>
    %331 = arith.subf %316, %330 : vector<16x32xf32>
    %cst_134 = arith.constant 9.99999996E-13 : f32
    %332 = vector.broadcast %cst_134 : f32 to vector<16x1xf32>
    %333 = arith.addf %329, %332 : vector<16x1xf32>
    %334 = math.rsqrt %333 : vector<16x1xf32>
    %335 = vector.broadcast %334 : vector<16x1xf32> to vector<16x32xf32>
    %336 = arith.mulf %331, %335 : vector<16x32xf32>
    %337 = vector.broadcast %317 : vector<1x32xf32> to vector<16x32xf32>
    %338 = arith.mulf %336, %337 : vector<16x32xf32>
    %339 = vector.broadcast %318 : vector<1x32xf32> to vector<16x32xf32>
    %340 = arith.addf %338, %339 : vector<16x32xf32>
    %341 = arith.truncf %340 : vector<16x32xf32> to vector<16x32xbf16>
    %c0_135 = arith.constant 0 : index
    %c0_136 = arith.constant 0 : index
    %342 = vector.load %arg24[%c0_135, %c0_136] : memref<32x64xbf16, #tpu.memory_space<vmem>>, vector<32x64xbf16>
    %cst_137 = arith.constant dense<0.000000e+00> : vector<16x64xf32>
    %343 = tpu.matmul %341, %342, %cst_137 {dimension_numbers = #tpu.dot_dimension_numbers<[1], [0], [0], [1], [0, 0, 1, 1], [], []>} : vector<16x32xbf16>, vector<32x64xbf16>, vector<16x64xf32> -> vector<16x64xf32>
    %c0_138 = arith.constant 0 : index
    %c0_139 = arith.constant 0 : index
    %344 = vector.load %arg25[%c0_138, %c0_139] : memref<1x64xf32, #tpu.memory_space<vmem>>, vector<1x64xf32>
    %345 = vector.broadcast %344 : vector<1x64xf32> to vector<16x64xf32>
    %346 = arith.addf %343, %345 : vector<16x64xf32>
    %cst_140 = arith.constant 5.000000e-01 : f32
    %347 = vector.broadcast %cst_140 : f32 to vector<16x64xf32>
    %348 = arith.mulf %347, %346 : vector<16x64xf32>
    %cst_141 = arith.constant 4.471500e-02 : f32
    %349 = vector.broadcast %cst_141 : f32 to vector<16x64xf32>
    %350 = arith.mulf %349, %346 : vector<16x64xf32>
    %351 = arith.mulf %350, %346 : vector<16x64xf32>
    %352 = arith.mulf %351, %346 : vector<16x64xf32>
    %353 = arith.addf %346, %352 : vector<16x64xf32>
    %cst_142 = arith.constant 0.797884583 : f32
    %354 = vector.broadcast %cst_142 : f32 to vector<16x64xf32>
    %355 = arith.mulf %354, %353 : vector<16x64xf32>
    %356 = math.tanh %355 : vector<16x64xf32>
    %cst_143 = arith.constant 1.000000e+00 : f32
    %357 = vector.broadcast %cst_143 : f32 to vector<16x64xf32>
    %358 = arith.addf %357, %356 : vector<16x64xf32>
    %359 = arith.mulf %348, %358 : vector<16x64xf32>
    %360 = arith.truncf %359 : vector<16x64xf32> to vector<16x64xbf16>
    %c0_144 = arith.constant 0 : index
    %c0_145 = arith.constant 0 : index
    %361 = vector.load %arg26[%c0_144, %c0_145] : memref<64x32xbf16, #tpu.memory_space<vmem>>, vector<64x32xbf16>
    %cst_146 = arith.constant dense<0.000000e+00> : vector<16x32xf32>
    %362 = tpu.matmul %360, %361, %cst_146 {dimension_numbers = #tpu.dot_dimension_numbers<[1], [0], [0], [1], [0, 0, 1, 1], [], []>} : vector<16x64xbf16>, vector<64x32xbf16>, vector<16x32xf32> -> vector<16x32xf32>
    %c0_147 = arith.constant 0 : index
    %c0_148 = arith.constant 0 : index
    %363 = vector.load %arg27[%c0_147, %c0_148] : memref<1x32xf32, #tpu.memory_space<vmem>>, vector<1x32xf32>
    %364 = vector.broadcast %363 : vector<1x32xf32> to vector<16x32xf32>
    %365 = arith.addf %362, %364 : vector<16x32xf32>
    %366 = arith.addf %340, %365 : vector<16x32xf32>
    %c0_149 = arith.constant 0 : index
    %c0_150 = arith.constant 0 : index
    %367 = vector.load %arg28[%c0_149, %c0_150] : memref<1x32xf32, #tpu.memory_space<vmem>>, vector<1x32xf32>
    %c0_151 = arith.constant 0 : index
    %c0_152 = arith.constant 0 : index
    %368 = vector.load %arg29[%c0_151, %c0_152] : memref<1x32xf32, #tpu.memory_space<vmem>>, vector<1x32xf32>
    %cst_153 = arith.constant dense<0.000000e+00> : vector<16xf32>
    %369 = vector.multi_reduction <add>, %366, %cst_153 [1] : vector<16x32xf32> to vector<16xf32>
    %370 = vector.shape_cast %369 : vector<16xf32> to vector<16x1xf32>
    %cst_154 = arith.constant 3.200000e+01 : f32
    %371 = vector.broadcast %cst_154 : f32 to vector<16x1xf32>
    %372 = arith.divf %370, %371 : vector<16x1xf32>
    %373 = vector.broadcast %372 : vector<16x1xf32> to vector<16x32xf32>
    %374 = arith.subf %366, %373 : vector<16x32xf32>
    %375 = arith.mulf %374, %374 : vector<16x32xf32>
    %cst_155 = arith.constant dense<0.000000e+00> : vector<16xf32>
    %376 = vector.multi_reduction <add>, %375, %cst_155 [1] : vector<16x32xf32> to vector<16xf32>
    %377 = vector.shape_cast %376 : vector<16xf32> to vector<16x1xf32>
    %cst_156 = arith.constant 3.200000e+01 : f32
    %378 = vector.broadcast %cst_156 : f32 to vector<16x1xf32>
    %379 = arith.divf %377, %378 : vector<16x1xf32>
    %380 = vector.broadcast %372 : vector<16x1xf32> to vector<16x32xf32>
    %381 = arith.subf %366, %380 : vector<16x32xf32>
    %cst_157 = arith.constant 9.99999996E-13 : f32
    %382 = vector.broadcast %cst_157 : f32 to vector<16x1xf32>
    %383 = arith.addf %379, %382 : vector<16x1xf32>
    %384 = math.rsqrt %383 : vector<16x1xf32>
    %385 = vector.broadcast %384 : vector<16x1xf32> to vector<16x32xf32>
    %386 = arith.mulf %381, %385 : vector<16x32xf32>
    %387 = vector.broadcast %367 : vector<1x32xf32> to vector<16x32xf32>
    %388 = arith.mulf %386, %387 : vector<16x32xf32>
    %389 = vector.broadcast %368 : vector<1x32xf32> to vector<16x32xf32>
    %390 = arith.addf %388, %389 : vector<16x32xf32>
    %c0_158 = arith.constant 0 : index
    %c0_159 = arith.constant 0 : index
    %391 = vector.load %arg32[%c0_158, %c0_159] : memref<16x32xf32, #tpu.memory_space<vmem>>, vector<16x32xf32>
    tpu.vector_store %arg32[%c0_158, %c0_159], %390 {strides = array<i32>} : memref<16x32xf32, #tpu.memory_space<vmem>>, vector<16x32xf32>,
    %392 = vector.extract_strided_slice %390 {offsets = [0, 0], sizes = [1, 32], strides = [1, 1]} : vector<16x32xf32> to vector<1x32xf32>
    %393 = vector.extract_strided_slice %390 {offsets = [8, 0], sizes = [1, 32], strides = [1, 1]} : vector<16x32xf32> to vector<1x32xf32>
    %394 = tpu.concatenate %392, %393 in 0 : vector<1x32xf32>, vector<1x32xf32> -> vector<2x32xf32>
    %395 = arith.truncf %394 : vector<2x32xf32> to vector<2x32xbf16>
    %c0_160 = arith.constant 0 : index
    %c0_161 = arith.constant 0 : index
    %396 = vector.load %arg30[%c0_160, %c0_161] : memref<32x32xbf16, #tpu.memory_space<vmem>>, vector<32x32xbf16>
    %cst_162 = arith.constant dense<0.000000e+00> : vector<2x32xf32>
    %397 = tpu.matmul %395, %396, %cst_162 {dimension_numbers = #tpu.dot_dimension_numbers<[1], [0], [0], [1], [0, 0, 1, 1], [], []>} : vector<2x32xbf16>, vector<32x32xbf16>, vector<2x32xf32> -> vector<2x32xf32>
    %c0_163 = arith.constant 0 : index
    %c0_164 = arith.constant 0 : index
    %398 = vector.load %arg31[%c0_163, %c0_164] : memref<1x32xf32, #tpu.memory_space<vmem>>, vector<1x32xf32>
    %399 = vector.broadcast %398 : vector<1x32xf32> to vector<2x32xf32>
    %400 = arith.addf %397, %399 : vector<2x32xf32>
    %401 = math.tanh %400 : vector<2x32xf32>
    %c0_165 = arith.constant 0 : index
    %c0_166 = arith.constant 0 : index
    %402 = vector.load %arg33[%c0_165, %c0_166] : memref<2x32xf32, #tpu.memory_space<vmem>>, vector<2x32xf32>
    tpu.vector_store %arg33[%c0_165, %c0_166], %401 {strides = array<i32>} : memref<2x32xf32, #tpu.memory_space<vmem>>, vector<2x32xf32>,
    return
  }
}

</mosaic_0001>

<bundles_post_ra>
// kernel: text_model_forward.1
= control target key start
LH: loop header
LB: loop body
LE: loop exit
PB: predicated region body
PF: predicated region fallthrough
CT: control target
= control target key end

     0   :  { %s2703_s6 = smov 1   ;;  %s2704_s10 = smov 2   ;;  %s3260_s0 = inlined_call_operand.smem [shape: u32[34], index: -1, kind: input, shape index: {}] }
   0x1   :  { %s2757_s5 = sld [smem:[%s3260_s0]]   ;;  %s2705_s14 = smov 3  }
   0x2   :  { %s2762_s9 = sld [smem:[%s3260_s0 + %s2703_s6]]   ;;  %s2706_s18 = smov 4  }
   0x3   :  { %s2767_s13 = sld [smem:[%s3260_s0 + %s2704_s10]]   ;;  %s2707_s22 = smov 5  }
   0x4   :  { %s2772_s17 = sld [smem:[%s3260_s0 + %s2705_s14]]   ;;  %s2708_s26 = smov 6  }
   0x5   :  { %s2777_s21 = sld [smem:[%s3260_s0 + %s2706_s18]]   ;;  %s2709_s30 = smov 7  }
   0x6   :  { %s2782_s25 = sld [smem:[%s3260_s0 + %s2707_s22]]   ;;  %s2710_s4 = smov 8  }
   0x7   :  { %s2787_s29 = sld [smem:[%s3260_s0 + %s2708_s26]]   ;;  %s2711_s10 = smov 9  }
   0x8   :  { %s2792_s3 = sld [smem:[%s3260_s0 + %s2709_s30]]   ;;  %s2712_s15 = smov 10  }
   0x9   :  { %s2797_s8 = sld [smem:[%s3260_s0 + %s2710_s4]]   ;;  %s2713_s20 = smov 11  }
   0xa   :  { %s2802_s14 = sld [smem:[%s3260_s0 + %s2711_s10]]   ;;  %s2714_s26 = smov 12  }
   0xb   :  { %s2807_s19 = sld [smem:[%s3260_s0 + %s2712_s15]]   ;;  %s2715_s1 = smov 13  }
   0xc   :  { %s2812_s24 = sld [smem:[%s3260_s0 + %s2713_s20]]   ;;  %s2716_s7 = smov 14  }
   0xd   :  { %s2817_s30 = sld [smem:[%s3260_s0 + %s2714_s26]]   ;;  %s2717_s15 = smov 15  }
   0xe   :  { %s2822_s6 = sld [smem:[%s3260_s0 + %s2715_s1]]   ;;  %s2718_s22 = smov 16  }
   0xf   :  { %s2827_s12 = sld [smem:[%s3260_s0 + %s2716_s7]]   ;;  %s2719_s28 = smov 17  }
  0x10   :  { %s2832_s20 = sld [smem:[%s3260_s0 + %s2717_s15]]   ;;  %s2720_s7 = smov 18  }
  0x11   :  { %s2837_s27 = sld [smem:[%s3260_s0 + %s2718_s22]]   ;;  %s2721_s15 = smov 19  }
  0x12   :  { %s2842_s4 = sld [smem:[%s3260_s0 + %s2719_s28]]   ;;  %s2722_s22 = smov 20  }
  0x13   :  { %s2723_s28 = smov 21  }
  0x14   :  { %3265 = sst [smem:[#allocation9_spill]] %s2822_s6 }
  0x15   :  { %s2847_s6 = sld [smem:[%s3260_s0 + %s2720_s7]]   ;;  %s2724_s7 = smov 22  }
  0x16   :  { %3266 = sst [smem:[#allocation10_spill]] %s2832_s20 }
  0x17   :  { %3267 = sst [smem:[#allocation11_spill]] %s2837_s27 }
  0x18   :  { %3268 = sst [smem:[#allocation12_spill]] %s2842_s4 }
  0x19   :  { %s2852_s20 = sld [smem:[%s3260_s0 + %s2721_s15]]   ;;  %s2725_s15 = smov 23  }
  0x1a   :  { %s2857_s27 = sld [smem:[%s3260_s0 + %s2722_s22]]   ;;  %s2726_s22 = smov 24  }
  0x1b   :  { %3269 = sst [smem:[#allocation13_spill]] %s2847_s6 }
  0x1c   :  { %s2862_s4 = sld [smem:[%s3260_s0 + %s2723_s28]]   ;;  %s2727_s28 = smov 25  }
  0x1d   :  { %s2867_s6 = sld [smem:[%s3260_s0 + %s2724_s7]]   ;;  %s2728_s7 = smov 26  }
  0x1f   :  { %3270 = sst [smem:[#allocation14_spill]] %s2852_s20 }
  0x20   :  { %3271 = sst [smem:[#allocation15_spill]] %s2857_s27 }
  0x21   :  { %s2872_s20 = sld [smem:[%s3260_s0 + %s2725_s15]]   ;;  %s2729_s15 = smov 27  }
  0x22   :  { %3272 = sst [smem:[#allocation16_spill]] %s2862_s4 }
  0x23   :  { %3273 = sst [smem:[#allocation17_spill]] %s2867_s6 }
  0x24   :  { %s2877_s27 = sld [smem:[%s3260_s0 + %s2726_s22]]   ;;  %s2730_s22 = smov 28  }
  0x25   :  { %s2882_s4 = sld [smem:[%s3260_s0 + %s2727_s28]]   ;;  %s2731_s28 = smov 29  }
  0x26   :  { %s2887_s6 = sld [smem:[%s3260_s0 + %s2728_s7]]   ;;  %s2732_s7 = smov 30  }
  0x27   :  { %3274 = sst [smem:[#allocation18_spill]] %s2872_s20 }
  0x28   :  { %s2892_s20 = sld [smem:[%s3260_s0 + %s2729_s15]]   ;;  %s2733_s15 = smov 31  }
  0x2a   :  { %3275 = sst [smem:[#allocation19_spill]] %s2877_s27 }
  0x2b   :  { %3276 = sst [smem:[#allocation20_spill]] %s2882_s4 }
  0x2c   :  { %3277 = sst [smem:[#allocation21_spill]] %s2887_s6 }
  0x2d   :  { %s2897_s27 = sld [smem:[%s3260_s0 + %s2730_s22]]   ;;  %s2734_s22 = smov 32  }
  0x2e   :  { %3278 = sst [smem:[#allocation22_spill]] %s2892_s20 }
  0x2f   :  { %s2902_s4 = sld [smem:[%s3260_s0 + %s2731_s28]]   ;;  %s2735_s28 = smov 33  }
  0x30   :  { %s2907_s6 = sld [smem:[%s3260_s0 + %s2732_s7]]  }
  0x31   :  { %s2912_s20 = sld [smem:[%s3260_s0 + %s2733_s15]]  }
  0x33   :  { %3279 = sst [smem:[#allocation23_spill]] %s2897_s27 }
  0x34   :  { %s2917_s27 = sld [smem:[%s3260_s0 + %s2734_s22]]  }
  0x35   :  { %3280 = sst [smem:[#allocation24_spill]] %s2902_s4 }
  0x36   :  { %s2922_s4 = sld [smem:[%s3260_s0 + %s2735_s28]]  }
  0x37   :  { %73 = vsyncpa [#allocation4], 0  ;;  %v140_v0 = vld [vmem:[%s2757_s5] sm:$0xff]  ;;  %vm178_vm0 = vcmask 1043456   ;;  %v2736_v2 = vmov 0   ;;  %v167_v3 = vld [vmem:[%s2767_s13 + $0x58] sm:$0xff] }
  0x38   :  { %v168_v1 = vld [vmem:[%s2767_s13 + $0x60] sm:$0xf]  ;;  %2574 = vset.pattern.permute.xlu0 %v2736_v2  ;;  %v166_v4 = vld [vmem:[%s2767_s13 + $0x50] sm:$0xff]  ;;  %v141_v5 = vld [vmem:[%s2757_s5 + $0x8] sm:$0xff]  ;;  %v2737_v6 = vmov 0.0  }
  0x39   :  { %2323 = vmatprep.subr.msk.mxu0 %vm178_vm0, %v168_v1  ;;  %145 = vperm.xlu0 %2574, %v140_v0   ;;  %v165_v7 = vld [vmem:[%s2767_s13 + $0x48] sm:$0xff]  ;;  %v164_v8 = vld [vmem:[%s2767_s13 + $0x40] sm:$0xff]  ;;  %v163_v9 = vld [vmem:[%s2767_s13 + $0x38] sm:$0xff] }
  0x3a   :  { %2324 = vmatpush3.msk.msra.mxu0 %vm178_vm0, %v168_v1  ;;  %2352 = vmatprep.subr.bf16.mxu1 %v2737_v6  ;;  %v162_v10 = vld [vmem:[%s2767_s13 + $0x30] sm:$0xff]  ;;  %v161_v11 = vld [vmem:[%s2767_s13 + $0x28] sm:$0xff]  ;;  %v160_v12 = vld [vmem:[%s2767_s13 + $0x20] sm:$0xff] }
  0x3b   :  { %2325 = vmatprep.subr.mxu0 %v167_v3  ;;  %v159_v13 = vld [vmem:[%s2767_s13 + $0x18] sm:$0xff]  ;;  %v158_v14 = vld [vmem:[%s2767_s13 + $0x10] sm:$0xff]  ;;  %v157_v15 = vld [vmem:[%s2767_s13 + $0x8] sm:$0xff] }
  0x3c   :  { %2326 = vmatpush3.msra.mxu0 %v167_v3 }
  0x3d   :  { %2327 = vmatprep.subr.mxu0 %v166_v4  ;;  %148 = vperm.xlu0 %2574, %v141_v5  }
  0x3e   :  { %2328 = vmatpush3.msra.mxu0 %v166_v4 }
  0x3f   :  { %2329 = vmatprep.subr.mxu0 %v165_v7 }
  0x40   :  { %2330 = vmatpush3.msra.mxu0 %v165_v7 }
  0x41   :  { %2331 = vmatprep.subr.mxu0 %v164_v8 }
  0x42   :  { %2332 = vmatpush3.msra.mxu0 %v164_v8 }
  0x43   :  { %2333 = vmatprep.subr.mxu0 %v163_v9 }
  0x44   :  { %2334 = vmatpush3.msra.mxu0 %v163_v9 }
  0x45   :  { %2335 = vmatprep.subr.mxu0 %v162_v10 }
  0x46   :  { %2336 = vmatpush3.msra.mxu0 %v162_v10 }
  0x47   :  { %2337 = vmatprep.subr.mxu0 %v161_v11 }
  0x48   :  { %2338 = vmatpush3.msra.mxu0 %v161_v11 }
  0x49   :  { %2339 = vmatprep.subr.mxu0 %v160_v12 }
  0x4a   :  { %2340 = vmatpush3.msra.mxu0 %v160_v12 }
  0x4b   :  { %2341 = vmatprep.subr.mxu0 %v159_v13 }
  0x4c   :  { %2342 = vmatpush3.msra.mxu0 %v159_v13 }
  0x4d   :  { %74 = vsyncpa [#allocation6], 0  ;;  %2343 = vmatprep.subr.mxu0 %v158_v14  ;;  %v156_v16 = vld [vmem:[%s2767_s13] sm:$0xff]  ;;  %v142_v17 = vlaneseq  ;;  %vm171_vm1 = vcmask 818176   ;;  %v170_v25 = vld [vmem:[%s2772_s17 + $0x8] sm:$0xff]  ;;  %vm259_vm4 = vcmask 261120  }
  0x4e   :  { %2344 = vmatpush3.msra.mxu0 %v158_v14  ;;  %v169_v24 = vld [vmem:[%s2772_s17] sm:$0xff]  ;;  %v2575_v41 = vld [vmem:[%s2787_s29 + $0x8] sm:$0xff]   ;;  %vm2738_vm5 = vmmov 0   ;;  %s2739_s0 = smov 64   ;;  %s2740_s5 = smov 96   ;;  %vm376_vm6 = vcmask 130048  }
  0x4f   :  { %2345 = vmatprep.subr.mxu0 %v157_v15  ;;  %v143_v18 = vand.u32 127, %v142_v17  ;;  %2356 = vmatprep.mubr.msk.bf16.mxu1 %vm2738_vm5, %v2737_v6  ;;  %v2576_v42 = vld [vmem:[%s2787_s29] sm:$0xff]   ;;  %v2987_v9 = vshrl.u32 %v142_v17, 7  ;;  %vm429_vm7 = vcmask 64512   ;;  %s2741_s13 = smov 112   ;;  %s2743_s17 = smov 48  }
  0x50   :  { %2346 = vmatpush3.msra.mxu0 %v157_v15  ;;  %2353 = vmatpush3.bf16.msra.mxu1 %v2575_v41  ;;  %v2179_v51 = vld [vmem:[%s2777_s21] ss:$0 sm:$0xff]  ;;  %s2744_s21 = smov 16   ;;  %vm607_vm8 = vcmask 261248   ;;  %s3282_s29 = sld [smem:[#allocation10_spill]]  ;;  %vm1084_vm9 = vcmask 523264  }
  0x51   :  { %2347 = vmatprep.subr.mxu0 %v156_v16  ;;  %2354 = vmatprep.subr.bf16.mxu1 %v2737_v6  ;;  %v2180_v55 = vld [vmem:[%s2782_s25] ss:$0 sm:$0xff]  ;;  %v426_v10 = vsub.s32 0, %v2987_v9  ;;  %s3281_s25 = sld [smem:[#allocation9_spill]]  ;;  %vm2039_vm10 = vcmask 1040384  }
  0x52   :  { %2348 = vmatpush3.msra.mxu0 %v156_v16  ;;  %v2181_v61 = vld [vmem:[%s2792_s3] ss:$0 sm:$0xff]  ;;  %s3283_s3 = sld [smem:[#allocation13_spill]] }
  0x53   :  { %2378 = vmatprep.subr.bf16.mxu0 %v2737_v6  ;;  %v2991_v11 = vld [vmem:[%s2762_s9] sm:$0x3]  ;;  %s2742_s9 = smov 80   ;;  %s3290_s7 = sld [smem:[#allocation17_spill]] }
  0x54   :  { %2355 = vmatpush3.bf16.msra.mxu1 %v2576_v42  ;;  %v2994_v12 = vrot.slane %v2991_v11, %v426_v10  ;;  %s3291_s10 = sld [smem:[#allocation18_spill]] }
  0x55   :  { %2360 = vmatprep.subr.bf16.mxu1 %v2737_v6  ;;  %s3292_s11 = sld [smem:[#allocation21_spill]] }
  0x56   :  { %s3293_s15 = sld [smem:[#allocation20_spill]] }
  0x57   :  { %s3294_s16 = sld [smem:[#allocation22_spill]] }
  0x58   :  { %s3295_s18 = sld [smem:[#allocation23_spill]] }
  0x59   :  { %s3296_s22 = sld [smem:[#allocation24_spill]] }
  0xb4   :  { %v146_v19 = vpop.permute.xlu0 %145 }
  0xb5   :  { %vm150_vm2 = vcmp.eq.s32.totalorder %v143_v18, %v146_v19 }
  0xb6   :  { %v2174_v20 = vsel %vm150_vm2, 1.0, %v2737_v6 }
  0xb7   :  { %2349 = vmatprep.mubr.msk.f32.mxu0 %vm171_vm1, %v2174_v20 }
  0xb8   :  { %v149_v21 = vpop.permute.xlu0 %148 }
  0xb9   :  { %vm151_vm3 = vcmp.eq.s32.totalorder %v143_v18, %v149_v21 }
  0xba   :  { %v2175_v22 = vsel %vm151_vm3, 1.0, %v2737_v6 }
  0xbb   :  { %2350 = vmatmul.mubr.msk.f32.vlgmr.msra.gmra.mxu0 %vm171_vm1, %v2175_v22 }
  0xbc   :  { %2380 = vmatprep.mubr.msk.bf16.mxu0 %vm2738_vm5, %v2737_v6 }
 0x17b   :  { %v2351_v23 = vpop.f32.mrf.mxu0 }
 0x17c   :  { %v254_v28 = vadd.f32 %v2351_v23, %v170_v25 }
 0x17d   :  { %v248_v26 = vpop.f32.mrf.mxu0 }
 0x17e   :  { %v249_v27 = vadd.f32 %v248_v26, %v169_v24  ;;  %v263_v30 = vsel %vm259_vm4, %v254_v28, 0.0 }
 0x180   :  { %v260_v29 = vsel %vm259_vm4, %v249_v27, 0.0 }
 0x181   :  { %261 = vadd.xlane.f32.xlu1 %v260_v29 }
 0x185   :  { %264 = vadd.xlane.f32.xlu1 %v263_v30 }
 0x20a   :  { %v262_v31 = vpop.xlane.xlu1 %261 }
 0x20b   :  { %v267_v32 = vmul.f32 0.03125, %v262_v31 }
 0x20d   :  { %v269_v33 = vsub.f32 %v249_v27, %v267_v32 }
 0x20e   :  { %v265_v34 = vpop.xlane.xlu1 %264 }
 0x20f   :  { %v268_v35 = vmul.f32 0.03125, %v265_v34  ;;  %v271_v36 = vmul.f32 %v269_v33, %v269_v33 }
 0x211   :  { %v270_v37 = vsub.f32 %v254_v28, %v268_v35  ;;  %v273_v38 = vsel %vm259_vm4, %v271_v36, 0.0 }
 0x212   :  { %274 = vadd.xlane.f32.xlu0 %v273_v38 }
 0x213   :  { %v272_v39 = vmul.f32 %v270_v37, %v270_v37 }
 0x215   :  { %v276_v40 = vsel %vm259_vm4, %v272_v39, 0.0 }
 0x216   :  { %277 = vadd.xlane.f32.xlu1 %v276_v40 }
 0x29b   :  { %v275_v43 = vpop.xlane.xlu0 %274 }
 0x29c   :  { %v279_v44 = vmul.f32 0.03125, %v275_v43 }
 0x29e   :  { %v281_v45 = vadd.f32 1e-12, %v279_v44 }
 0x29f   :  { %v278_v46 = vpop.xlane.xlu1 %277 }
 0x2a0   :  { %2597 = vrsqrt.f32 %v281_v45  ;;  %v280_v47 = vmul.f32 0.03125, %v278_v46 }
 0x2a2   :  { %v282_v48 = vadd.f32 1e-12, %v280_v47 }
 0x2a4   :  { %2599 = vrsqrt.f32 %v282_v48 }
 0x2ad   :  { %v2598_v49 = vpop.eup %2597 }
 0x2ae   :  { %v285_v50 = vmul.f32 %v2598_v49, %v269_v33 }
 0x2b0   :  { %v293_v54 = vmul.f32 %v2179_v51, %v285_v50 }
 0x2b1   :  { %v2600_v52 = vpop.eup %2599 }
 0x2b2   :  { %v286_v53 = vmul.f32 %v2600_v52, %v270_v37  ;;  %v2962_v57 = vadd.f32 %v2180_v55, %v293_v54 }
 0x2b4   :  { %v294_v56 = vmul.f32 %v2179_v51, %v286_v53 }
 0x2b6   :  { %v2964_v58 = vadd.f32 %v2180_v55, %v294_v56 }
 0x2b8   :  { %v304_v59 = vpack.c.bf16 %v2964_v58, %v2962_v57 }
 0x2ba   :  { %2357 = vmatmul.mubr.msk.bf16.vlgmr.msra.gmra.mxu1 %vm259_vm4, %v304_v59 }
 0x2bb   :  { %2362 = vmatprep.mubr.msk.bf16.mxu1 %vm2738_vm5, %v2737_v6 }
 0x37a   :  { %v365_v60 = vpop.f32.mrf.mxu1 }
 0x37b   :  { %v366_v0 = vadd.f32 %v2181_v61, %v365_v60 }
 0x37c   :  { %v2358_v62 = vpop.f32.mrf.mxu1 }
 0x37e   :  { %v368_v63 = vpop.f32.mrf.mxu1 }
 0x37f   :  { %v369_v1 = vadd.f32 %v2181_v61, %v368_v63 }
 0x380   :  { %v2359_v2 = vpop.f32.mrf.mxu1 }
 0x381   :  { %v2972_v3 = vpack.c.bf16 %v369_v1, %v366_v0  ;;  %v661_v0 = vsub.s32 1, %v2987_v9 }
 0x383   :  { %442 = vrot.lane.b32.xlu0 %v2972_v3, %s2739_s0  ;;  %374 = vrot.lane.b32.xlu1 %v2972_v3, %s2740_s5  ;;  %v3017_v43 = vrot.slane %v2972_v3, 4 }
 0x3f5   :  { %v375_v4 = vpop.permute.xlu1 %374  ;;  %v443_v7 = vpop.permute.xlu0 %442 }
 0x3f6   :  { %v381_v5 = vsel %vm376_vm6, %v375_v4, 0  ;;  %v448_v8 = vsel %vm178_vm0, %v443_v7, 0 }
 0x3f7   :  { %2361 = vmatpush3.bf16.xpose.msra.mxu1 %v381_v5 }
 0x3f8   :  { %2366 = vmatprep.subr.bf16.mxu1 %v2737_v6 }
 0x3fe   :  { %2363 = vmatmul.mubr.msk.bf16.vlgmr.msra.gmra.mxu1 %vm376_vm6, %v2972_v3 }
 0x3ff   :  { %2367 = vmatpush3.bf16.msra.mxu1 %v448_v8  ;;  %2368 = vmatprep.mubr.msk.bf16.mxu1 %vm2738_vm5, %v2737_v6 }
 0x400   :  { %2372 = vmatprep.subr.bf16.mxu1 %v2737_v6 }
 0x4be   :  { %v417_v13 = vpop.f32.mrf.mxu1 }
 0x4bf   :  { %v423_v14 = vmul.f32 0.25, %v417_v13 }
 0x4c0   :  { %v2364_v15 = vpop.f32.mrf.mxu1 }
 0x4c1   :  { %v428_v16 = vadd.f32 %v2994_v12, %v423_v14 }
 0x4c2   :  { %v420_v18 = vpop.f32.mrf.mxu1 }
 0x4c3   :  { %v430_v19 = vsel %vm429_vm7, %v428_v16, -inf }
 0x4c4   :  { %431 = vmax.xlane.f32.xlu1 %v430_v19  ;;  %v2365_v20 = vpop.f32.mrf.mxu1 }
 0x4d5   :  { %491 = vrot.lane.b32.xlu1 %v2972_v3, %s2741_s13 }
 0x54d   :  { %v432_v17 = vpop.xlane.xlu1 %431 }
 0x54e   :  { %v433_v21 = vsub.f32 %v428_v16, %v432_v17 }
 0x550   :  { %v434_v22 = vmul.f32 1.442695, %v433_v21 }
 0x551   :  { %v492_v31 = vpop.permute.xlu1 %491 }
 0x552   :  { %2601 = vpow2.f32 %v434_v22 }
 0x55f   :  { %v2602_v23 = vpop.eup %2601 }
 0x560   :  { %v436_v24 = vsel %vm429_vm7, %v2602_v23, 0.0 }
 0x561   :  { %437 = vadd.xlane.f32.xlu0 %v436_v24 }
 0x577   :  { %493 = vrot.lane.b32.xlu0 %v2972_v3, %s2742_s9 }
 0x5ea   :  { %v438_v25 = vpop.xlane.xlu0 %437 }
 0x5eb   :  { %2603 = vrcp.f32 %v438_v25 }
 0x5ee   :  { %v494_v28 = vpop.permute.xlu0 %493 }
 0x5ef   :  { %v499_v30 = vsel %vm376_vm6, %v494_v28, 0 }
 0x5f8   :  { %v2604_v26 = vpop.eup %2603 }
 0x5f9   :  { %v440_v27 = vmul.f32 %v2604_v26, %v2602_v23 }
 0x5fb   :  { %v441_v29 = vpack.c.bf16 %v440_v27, %v440_v27 }
 0x5fd   :  { %2369 = vmatmul.mubr.msk.bf16.vlgmr.msra.gmra.mxu1 %vm429_vm7, %v441_v29 }
 0x5fe   :  { %2373 = vmatpush3.bf16.xpose.msra.mxu1 %v499_v30  ;;  %2374 = vmatprep.mubr.msk.bf16.mxu1 %vm2738_vm5, %v2737_v6 }
 0x5ff   :  { %2390 = vmatprep.subr.bf16.mxu1 %v2737_v6 }
 0x605   :  { %2375 = vmatmul.mubr.msk.bf16.vlgmr.msra.gmra.mxu1 %vm376_vm6, %v492_v31 }
 0x606   :  { %2392 = vmatprep.mubr.msk.bf16.mxu1 %vm2738_vm5, %v2737_v6 }
 0x6bd   :  { %v484_v32 = vpop.f32.mrf.mxu1 }
 0x6be   :  { %490 = vst.msk [vmem:[#allocation2] sm:$0xff] %vm376_vm6, %v484_v32 }
 0x6bf   :  { %v2370_v33 = vpop.f32.mrf.mxu1 }
 0x6c1   :  { %v487_v34 = vpop.f32.mrf.mxu1 }
 0x6c3   :  { %v2371_v35 = vpop.f32.mrf.mxu1 }
 0x6c5   :  { %v535_v36 = vpop.f32.mrf.mxu1 }
 0x6c6   :  { %v541_v37 = vmul.f32 0.25, %v535_v36 }
 0x6c7   :  { %v2376_v38 = vpop.f32.mrf.mxu1 }
 0x6c8   :  { %v542_v39 = vadd.f32 %v541_v37, %v2994_v12 }
 0x6c9   :  { %v538_v40 = vpop.f32.mrf.mxu1 }
 0x6ca   :  { %v543_v41 = vsel %vm429_vm7, %v542_v39, -inf }
 0x6cb   :  { %544 = vmax.xlane.f32.xlu0 %v543_v41  ;;  %v2377_v42 = vpop.f32.mrf.mxu1 }
 0x6e1   :  { %555 = vrot.lane.b32.xlu0 %v2972_v3, %s2743_s17  ;;  %v3044_v3 = vrot.slane %v2991_v11, %v661_v0 }
 0x6e5   :  { %727 = vrot.lane.b32.xlu0 %v3017_v43, %s2742_s9 }
 0x6e9   :  { %725 = vrot.lane.b32.xlu0 %v3017_v43, %s2741_s13 }
 0x754   :  { %v545_v44 = vpop.xlane.xlu0 %544 }
 0x755   :  { %v546_v45 = vsub.f32 %v542_v39, %v545_v44  ;;  %v2578_v44 = vld [vmem:[%s2797_s8] sm:$0xff]  }
 0x757   :  { %v547_v46 = vmul.f32 1.442695, %v546_v45 }
 0x758   :  { %v556_v47 = vpop.permute.xlu0 %555 }
 0x759   :  { %2605 = vpow2.f32 %v547_v46  ;;  %v561_v48 = vsel %vm178_vm0, %v556_v47, 0 }
 0x75a   :  { %2379 = vmatpush3.bf16.msra.mxu0 %v561_v48 }
 0x75b   :  { %2384 = vmatprep.subr.bf16.mxu0 %v2737_v6 }
 0x75c   :  { %v728_v59 = vpop.permute.xlu0 %727 }
 0x75d   :  { %v733_v60 = vsel %vm376_vm6, %v728_v59, 0  ;;  %v2193_v59 = vld [vmem:[%s2802_s14] ss:$0 sm:$0xff]  ;;  %s3285_s14 = sld [smem:[#allocation12_spill]] }
 0x760   :  { %v726_v61 = vpop.permute.xlu0 %725 }
 0x766   :  { %v2606_v49 = vpop.eup %2605 }
 0x767   :  { %v549_v50 = vsel %vm429_vm7, %v2606_v49, 0.0 }
 0x768   :  { %550 = vadd.xlane.f32.xlu1 %v549_v50 }
 0x779   :  { %610 = vrot.lane.b32.xlu1 %v3017_v43, %s2740_s5 }
 0x7f1   :  { %v551_v51 = vpop.xlane.xlu1 %550 }
 0x7f2   :  { %2607 = vrcp.f32 %v551_v51 }
 0x7f5   :  { %v611_v54 = vpop.permute.xlu1 %610 }
 0x7f6   :  { %v616_v56 = vsel %vm376_vm6, %v611_v54, 0 }
 0x7ff   :  { %v2608_v52 = vpop.eup %2607 }
 0x800   :  { %v553_v53 = vmul.f32 %v2608_v52, %v2606_v49 }
 0x802   :  { %v554_v55 = vpack.c.bf16 %v553_v53, %v553_v53 }
 0x804   :  { %2381 = vmatmul.mubr.msk.bf16.vlgmr.msra.gmra.mxu0 %vm429_vm7, %v554_v55 }
 0x805   :  { %2385 = vmatpush3.bf16.xpose.msra.mxu0 %v616_v56  ;;  %2386 = vmatprep.mubr.msk.bf16.mxu0 %vm2738_vm5, %v2737_v6 }
 0x806   :  { %2396 = vmatprep.subr.bf16.mxu0 %v2737_v6 }
 0x80c   :  { %2387 = vmatmul.mubr.msk.bf16.vlgmr.msra.gmra.mxu0 %vm376_vm6, %v3017_v43 }
 0x80d   :  { %2397 = vmatpush3.bf16.xpose.msra.mxu0 %v733_v60  ;;  %2398 = vmatprep.mubr.msk.bf16.mxu0 %vm2738_vm5, %v2737_v6 }
 0x80e   :  { %2408 = vmatprep.subr.bf16.mxu0 %v2737_v6 }
 0x814   :  { %2399 = vmatmul.mubr.msk.bf16.vlgmr.msra.gmra.mxu0 %vm376_vm6, %v726_v61 }
 0x815   :  { %2412 = vmatprep.mubr.msk.bf16.mxu0 %vm2738_vm5, %v2737_v6 }
 0x8c4   :  { %v597_v62 = vpop.f32.mrf.mxu0 }
 0x8c6   :  { %v2382_v63 = vpop.f32.mrf.mxu0 }
 0x8c8   :  { %v600_v1 = vpop.f32.mrf.mxu0 }
 0x8ca   :  { %v2383_v2 = vpop.f32.mrf.mxu0 }
 0x8cc   :  { %v652_v4 = vpop.f32.mrf.mxu0 }
 0x8cd   :  { %v658_v5 = vmul.f32 0.25, %v652_v4 }
 0x8ce   :  { %v2388_v7 = vpop.f32.mrf.mxu0 }
 0x8cf   :  { %v663_v8 = vadd.f32 %v3044_v3, %v658_v5 }
 0x8d0   :  { %v655_v10 = vpop.f32.mrf.mxu0 }
 0x8d1   :  { %v664_v13 = vsel %vm429_vm7, %v663_v8, -inf }
 0x8d2   :  { %665 = vmax.xlane.f32.xlu0 %v664_v13  ;;  %v2389_v14 = vpop.f32.mrf.mxu0 }
 0x8d4   :  { %v769_v15 = vpop.f32.mrf.mxu0 }
 0x8d5   :  { %v775_v16 = vmul.f32 0.25, %v769_v15 }
 0x8d6   :  { %v2400_v18 = vpop.f32.mrf.mxu0 }
 0x8d7   :  { %v776_v9 = vadd.f32 %v775_v16, %v3044_v3 }
 0x8d8   :  { %v772_v19 = vpop.f32.mrf.mxu0 }
 0x8d9   :  { %v777_v20 = vsel %vm429_vm7, %v776_v9, -inf }
 0x8da   :  { %778 = vmax.xlane.f32.xlu1 %v777_v20  ;;  %v2401_v11 = vpop.f32.mrf.mxu0  ;;  %v2579_v20 = vld [vmem:[%s2817_s30 + $0x8] sm:$0xff]  }
 0x8eb   :  { %789 = vrot.lane.b32.xlu1 %v3017_v43, %s2743_s17 }
 0x8ef   :  { %604 = vrot.lane.b32.xlu1 %v597_v62, %s2744_s21 }
 0x95b   :  { %v666_v17 = vpop.xlane.xlu0 %665 }
 0x95c   :  { %v667_v21 = vsub.f32 %v663_v8, %v666_v17 }
 0x95e   :  { %v668_v22 = vmul.f32 1.442695, %v667_v21 }
 0x960   :  { %2609 = vpow2.f32 %v668_v22 }
 0x963   :  { %v779_v23 = vpop.xlane.xlu1 %778 }
 0x964   :  { %v780_v24 = vsub.f32 %v776_v9, %v779_v23 }
 0x966   :  { %v781_v25 = vmul.f32 1.442695, %v780_v24 }
 0x967   :  { %v790_v26 = vpop.permute.xlu1 %789 }
 0x968   :  { %2611 = vpow2.f32 %v781_v25  ;;  %v795_v39 = vsel %vm178_vm0, %v790_v26, 0 }
 0x96b   :  { %v605_v27 = vpop.permute.xlu1 %604 }
 0x96c   :  { %608 = vst.msk [vmem:[#allocation2] sm:$0xff] %vm607_vm8, %v605_v27  ;;  %v2197_v27 = vld [vmem:[%s2807_s19] ss:$0 sm:$0xff]  ;;  %s3286_s19 = sld [smem:[#allocation14_spill]] }
 0x96d   :  { %v2610_v28 = vpop.eup %2609 }
 0x96e   :  { %v670_v29 = vsel %vm429_vm7, %v2610_v28, 0.0 }
 0x96f   :  { %671 = vadd.xlane.f32.xlu0 %v670_v29 }
 0x973   :  { %v842_v54 = vld [vmem:[#allocation2] sm:$0xff] }
 0x975   :  { %v2612_v30 = vpop.eup %2611 }
 0x976   :  { %v783_v31 = vsel %vm429_vm7, %v2612_v30, 0.0 }
 0x977   :  { %784 = vadd.xlane.f32.xlu0 %v783_v31  ;;  %v2198_v31 = vld [vmem:[%s2812_s24] ss:$0 sm:$0xff]  ;;  %s3287_s24 = sld [smem:[#allocation15_spill]] }
 0x98d   :  { %676 = vrot.lane.b32.xlu0 %v3017_v43, %s2739_s0  ;;  %v2577_v43 = vld [vmem:[%s2797_s8 + $0x8] sm:$0xff]   ;;  %s3284_s8 = sld [smem:[#allocation11_spill]] }
 0x98e   :  { %2409 = vmatpush3.bf16.msra.mxu0 %v2577_v43 }
 0x98f   :  { %2410 = vmatprep.subr.bf16.mxu0 %v2737_v6 }
 0x992   :  { %2411 = vmatpush3.bf16.msra.mxu0 %v2578_v44 }
 0x993   :  { %2424 = vmatprep.subr.bf16.mxu0 %v2737_v6 }
 0x9f8   :  { %v672_v32 = vpop.xlane.xlu0 %671 }
 0x9f9   :  { %2613 = vrcp.f32 %v672_v32 }
 0xa00   :  { %v785_v33 = vpop.xlane.xlu0 %784 }
 0xa01   :  { %2615 = vrcp.f32 %v785_v33 }
 0xa04   :  { %v677_v34 = vpop.permute.xlu0 %676 }
 0xa05   :  { %v682_v35 = vsel %vm178_vm0, %v677_v34, 0 }
 0xa06   :  { %v2614_v36 = vpop.eup %2613  ;;  %2391 = vmatpush3.bf16.msra.mxu1 %v682_v35 }
 0xa07   :  { %2402 = vmatprep.subr.bf16.mxu1 %v2737_v6  ;;  %v674_v37 = vmul.f32 %v2614_v36, %v2610_v28  ;;  %v2581_v36 = vld [vmem:[%s2827_s12 + $0x18] sm:$0xff]  }
 0xa09   :  { %v675_v38 = vpack.c.bf16 %v674_v37, %v674_v37  ;;  %v2582_v37 = vld [vmem:[%s2827_s12 + $0x10] sm:$0xff]  }
 0xa0b   :  { %2393 = vmatmul.mubr.msk.bf16.vlgmr.msra.gmra.mxu1 %vm429_vm7, %v675_v38  ;;  %v2583_v38 = vld [vmem:[%s2827_s12 + $0x8] sm:$0xff]  }
 0xa0c   :  { %2403 = vmatpush3.bf16.msra.mxu1 %v795_v39  ;;  %2404 = vmatprep.mubr.msk.bf16.mxu1 %vm2738_vm5, %v2737_v6  ;;  %v2584_v39 = vld [vmem:[%s2827_s12] sm:$0xff]   ;;  %s3289_s12 = sld [smem:[#allocation19_spill]] }
 0xa0d   :  { %2416 = vmatprep.subr.bf16.mxu1 %v2737_v6 }
 0xa0e   :  { %v2616_v40 = vpop.eup %2615 }
 0xa0f   :  { %v787_v41 = vmul.f32 %v2616_v40, %v2612_v30  ;;  %v2199_v40 = vld [vmem:[%s3281_s25] ss:$0 sm:$0xff] }
 0xa11   :  { %v788_v42 = vpack.c.bf16 %v787_v41, %v787_v41 }
 0xa13   :  { %2405 = vmatmul.mubr.msk.bf16.vlgmr.msra.gmra.mxu1 %vm429_vm7, %v788_v42 }
 0xa14   :  { %2420 = vmatprep.mubr.msk.bf16.mxu1 %vm2738_vm5, %v2737_v6  ;;  %2417 = vmatpush3.bf16.msra.mxu1 %v2579_v20 }
 0xa15   :  { %2418 = vmatprep.subr.bf16.mxu1 %v2737_v6 }
 0xacb   :  { %v718_v45 = vpop.f32.mrf.mxu1 }
 0xacc   :  { %724 = vst.msk [vmem:[#allocation2 + $0x8] sm:$0xff] %vm376_vm6, %v718_v45 }
 0xacd   :  { %v2394_v46 = vpop.f32.mrf.mxu1 }
 0xacf   :  { %v721_v47 = vpop.f32.mrf.mxu1 }
 0xad1   :  { %v2395_v48 = vpop.f32.mrf.mxu1 }
 0xad3   :  { %v831_v49 = vpop.f32.mrf.mxu1 }
 0xad4   :  { %838 = vrot.lane.b32.xlu0 %v831_v49, %s2744_s21 }
 0xad5   :  { %v2406_v50 = vpop.f32.mrf.mxu1 }
 0xad7   :  { %v834_v51 = vpop.f32.mrf.mxu1 }
 0xad9   :  { %v2407_v52 = vpop.f32.mrf.mxu1 }
 0xb46   :  { %v839_v53 = vpop.permute.xlu0 %838 }
 0xb47   :  { %841 = vst.msk [vmem:[#allocation2 + $0x8] sm:$0xff] %vm607_vm8, %v839_v53 }
 0xb4e   :  { %v843_v55 = vld [vmem:[#allocation2 + $0x8] sm:$0xff] }
 0xb4f   :  { %v844_v56 = vpack.c.bf16 %v843_v55, %v842_v54 }
 0xb51   :  { %2413 = vmatmul.mubr.msk.bf16.vlgmr.msra.gmra.mxu0 %vm259_vm4, %v844_v56 }
 0xb52   :  { %2432 = vmatprep.mubr.msk.bf16.mxu0 %vm2738_vm5, %v2737_v6  ;;  %2425 = vmatpush3.bf16.msra.mxu0 %v2581_v36  ;;  %v2209_v36 = vld [vmem:[%s3284_s8] ss:$0 sm:$0xff] }
 0xb53   :  { %2426 = vmatprep.subr.bf16.mxu0 %v2737_v6 }
 0xb56   :  { %2427 = vmatpush3.bf16.msra.mxu0 %v2582_v37 }
 0xb57   :  { %2428 = vmatprep.subr.bf16.mxu0 %v2737_v6 }
 0xb5a   :  { %2429 = vmatpush3.bf16.msra.mxu0 %v2583_v38 }
 0xb5b   :  { %2430 = vmatprep.subr.bf16.mxu0 %v2737_v6 }
 0xb5e   :  { %2431 = vmatpush3.bf16.msra.mxu0 %v2584_v39 }
 0xb5f   :  { %2450 = vmatprep.subr.bf16.mxu0 %v2737_v6 }
 0xc11   :  { %v905_v60 = vpop.f32.mrf.mxu0 }
 0xc12   :  { %v906_v61 = vadd.f32 %v2193_v59, %v905_v60 }
 0xc13   :  { %v2414_v62 = vpop.f32.mrf.mxu0 }
 0xc14   :  { %v912_v63 = vadd.f32 %v906_v61, %v2962_v57 }
 0xc15   :  { %v908_v0 = vpop.f32.mrf.mxu0 }
 0xc16   :  { %v909_v1 = vadd.f32 %v2193_v59, %v908_v0  ;;  %v916_v2 = vsel %vm259_vm4, %v912_v63, 0.0 }
 0xc17   :  { %917 = vadd.xlane.f32.xlu1 %v916_v2  ;;  %v2415_v4 = vpop.f32.mrf.mxu0 }
 0xc18   :  { %v913_v5 = vadd.f32 %v909_v1, %v2964_v58  ;;  %v2580_v58 = vld [vmem:[%s2817_s30] sm:$0xff]   ;;  %s3288_s30 = sld [smem:[#allocation16_spill]] }
 0xc19   :  { %2419 = vmatpush3.bf16.msra.mxu1 %v2580_v58 }
 0xc1a   :  { %v919_v7 = vsel %vm259_vm4, %v913_v5, 0.0  ;;  %2436 = vmatprep.subr.bf16.mxu1 %v2737_v6 }
 0xc1b   :  { %920 = vadd.xlane.f32.xlu0 %v919_v7 }
 0xca0   :  { %v918_v8 = vpop.xlane.xlu1 %917 }
 0xca1   :  { %v922_v10 = vmul.f32 0.03125, %v918_v8 }
 0xca3   :  { %v924_v13 = vsub.f32 %v912_v63, %v922_v10 }
 0xca4   :  { %v921_v14 = vpop.xlane.xlu0 %920 }
 0xca5   :  { %v923_v15 = vmul.f32 0.03125, %v921_v14  ;;  %v926_v16 = vmul.f32 %v924_v13, %v924_v13 }
 0xca7   :  { %v925_v57 = vsub.f32 %v913_v5, %v923_v15  ;;  %v928_v18 = vsel %vm259_vm4, %v926_v16, 0.0  ;;  %v2203_v5 = vld [vmem:[%s3282_s29] ss:$0 sm:$0xff] }
 0xca8   :  { %929 = vadd.xlane.f32.xlu0 %v928_v18 }
 0xca9   :  { %v927_v9 = vmul.f32 %v925_v57, %v925_v57 }
 0xcab   :  { %v931_v19 = vsel %vm259_vm4, %v927_v9, 0.0 }
 0xcac   :  { %932 = vadd.xlane.f32.xlu1 %v931_v19 }
 0xd31   :  { %v930_v11 = vpop.xlane.xlu0 %929 }
 0xd32   :  { %v934_v17 = vmul.f32 0.03125, %v930_v11 }
 0xd34   :  { %v936_v21 = vadd.f32 1e-12, %v934_v17 }
 0xd35   :  { %v933_v22 = vpop.xlane.xlu1 %932 }
 0xd36   :  { %2617 = vrsqrt.f32 %v936_v21  ;;  %v935_v23 = vmul.f32 0.03125, %v933_v22 }
 0xd38   :  { %v937_v24 = vadd.f32 1e-12, %v935_v23 }
 0xd3a   :  { %2619 = vrsqrt.f32 %v937_v24 }
 0xd43   :  { %v2618_v25 = vpop.eup %2617 }
 0xd44   :  { %v940_v26 = vmul.f32 %v2618_v25, %v924_v13 }
 0xd46   :  { %v948_v30 = vmul.f32 %v2197_v27, %v940_v26  ;;  %v2585_v26 = vld [vmem:[%s3283_s3 + $0x8] sm:$0xff]  }
 0xd47   :  { %v2620_v28 = vpop.eup %2619 }
 0xd48   :  { %v941_v29 = vmul.f32 %v2620_v28, %v925_v57  ;;  %v956_v33 = vadd.f32 %v2198_v31, %v948_v30 }
 0xd4a   :  { %v949_v32 = vmul.f32 %v2197_v27, %v941_v29  ;;  %v2586_v27 = vld [vmem:[%s3283_s3] sm:$0xff]  }
 0xd4c   :  { %v957_v34 = vadd.f32 %v2198_v31, %v949_v32 }
 0xd4e   :  { %v958_v35 = vpack.c.bf16 %v957_v34, %v956_v33 }
 0xd50   :  { %2421 = vmatmul.mubr.msk.bf16.vlgmr.msra.gmra.mxu1 %vm259_vm4, %v958_v35 }
 0xd51   :  { %2440 = vmatprep.mubr.msk.bf16.mxu1 %vm2738_vm5, %v2737_v6  ;;  %2437 = vmatpush3.bf16.msra.mxu1 %v2585_v26 }
 0xd52   :  { %2438 = vmatprep.subr.bf16.mxu1 %v2737_v6 }
 0xd55   :  { %2439 = vmatpush3.bf16.msra.mxu1 %v2586_v27 }
 0xd56   :  { %2444 = vmatprep.subr.bf16.mxu1 %v2737_v6 }
 0xe10   :  { %v1019_v41 = vpop.f32.mrf.mxu1 }
 0xe11   :  { %v1020_v42 = vadd.f32 %v2199_v40, %v1019_v41 }
 0xe12   :  { %v2422_v43 = vpop.f32.mrf.mxu1 }
 0xe13   :  { %v1028_v44 = vmul.f32 0.044715, %v1020_v42  ;;  %v1026_v62 = vmul.f32 0.5, %v1020_v42 }
 0xe14   :  { %v1022_v45 = vpop.f32.mrf.mxu1 }
 0xe15   :  { %v1030_v46 = vmul.f32 %v1028_v44, %v1020_v42  ;;  %v1023_v47 = vadd.f32 %v2199_v40, %v1022_v45  ;;  %v2210_v40 = vld [vmem:[%s3285_s14] ss:$0 sm:$0xff] }
 0xe16   :  { %v2423_v48 = vpop.f32.mrf.mxu1 }
 0xe17   :  { %v1032_v49 = vmul.f32 %v1030_v46, %v1020_v42  ;;  %v1029_v50 = vmul.f32 0.044715, %v1023_v47  ;;  %v1027_v63 = vmul.f32 0.5, %v1023_v47  ;;  %v2211_v46 = vld [vmem:[%s3286_s19] ss:$0 sm:$0xff] }
 0xe19   :  { %v1034_v51 = vadd.f32 %v1032_v49, %v1020_v42  ;;  %v1031_v52 = vmul.f32 %v1029_v50, %v1023_v47 }
 0xe1b   :  { %v1036_v53 = vmul.f32 0.7978846, %v1034_v51  ;;  %v1033_v54 = vmul.f32 %v1031_v52, %v1023_v47 }
 0xe1d   :  { %2621 = vtanh.f32 %v1036_v53  ;;  %v1035_v55 = vadd.f32 %v1033_v54, %v1023_v47 }
 0xe1f   :  { %v1037_v56 = vmul.f32 0.7978846, %v1035_v55 }
 0xe21   :  { %2623 = vtanh.f32 %v1037_v56 }
 0xe2a   :  { %v2622_v59 = vpop.eup %2621 }
 0xe2b   :  { %v1040_v60 = vadd.f32 1.0, %v2622_v59 }
 0xe2d   :  { %v1042_v1 = vmul.f32 %v1040_v60, %v1026_v62 }
 0xe2e   :  { %v2624_v61 = vpop.eup %2623 }
 0xe2f   :  { %v1041_v0 = vadd.f32 1.0, %v2624_v61 }
 0xe31   :  { %v1043_v2 = vmul.f32 %v1041_v0, %v1027_v63 }
 0xe33   :  { %v1044_v4 = vpack.c.bf16 %v1043_v2, %v1042_v1 }
 0xe35   :  { %2433 = vmatmul.mubr.msk.bf16.vlgmr.msra.gmra.mxu0 %vm1084_vm9, %v1044_v4 }
 0xe36   :  { %2452 = vmatprep.mubr.msk.bf16.mxu0 %vm2738_vm5, %v2737_v6 }
 0xef5   :  { %v1122_v7 = vpop.f32.mrf.mxu0 }
 0xef6   :  { %v1123_v8 = vadd.f32 %v2203_v5, %v1122_v7 }
 0xef7   :  { %v2434_v10 = vpop.f32.mrf.mxu0 }
 0xef8   :  { %v1129_v13 = vadd.f32 %v1123_v8, %v956_v33 }
 0xef9   :  { %v1125_v14 = vpop.f32.mrf.mxu0 }
 0xefa   :  { %v1126_v15 = vadd.f32 %v2203_v5, %v1125_v14  ;;  %v1133_v16 = vsel %vm259_vm4, %v1129_v13, 0.0 }
 0xefb   :  { %1134 = vadd.xlane.f32.xlu0 %v1133_v16  ;;  %v2435_v57 = vpop.f32.mrf.mxu0 }
 0xefc   :  { %v1130_v18 = vadd.f32 %v1126_v15, %v957_v34 }
 0xefe   :  { %v1136_v9 = vsel %vm259_vm4, %v1130_v18, 0.0 }
 0xeff   :  { %1137 = vadd.xlane.f32.xlu1 %v1136_v9 }
 0xf84   :  { %v1135_v19 = vpop.xlane.xlu0 %1134 }
 0xf85   :  { %v1139_v20 = vmul.f32 0.03125, %v1135_v19 }
 0xf87   :  { %v1141_v58 = vsub.f32 %v1129_v13, %v1139_v20 }
 0xf88   :  { %v1138_v11 = vpop.xlane.xlu1 %1137 }
 0xf89   :  { %v1140_v17 = vmul.f32 0.03125, %v1138_v11  ;;  %v1143_v21 = vmul.f32 %v1141_v58, %v1141_v58 }
 0xf8b   :  { %v1142_v22 = vsub.f32 %v1130_v18, %v1140_v17  ;;  %v1145_v23 = vsel %vm259_vm4, %v1143_v21, 0.0 }
 0xf8c   :  { %1146 = vadd.xlane.f32.xlu0 %v1145_v23 }
 0xf8d   :  { %v1144_v24 = vmul.f32 %v1142_v22, %v1142_v22 }
 0xf8f   :  { %v1148_v25 = vsel %vm259_vm4, %v1144_v24, 0.0 }
 0xf90   :  { %1149 = vadd.xlane.f32.xlu1 %v1148_v25 }
0x1015   :  { %v1147_v28 = vpop.xlane.xlu0 %1146 }
0x1016   :  { %v1151_v29 = vmul.f32 0.03125, %v1147_v28 }
0x1018   :  { %v1153_v30 = vadd.f32 1e-12, %v1151_v29 }
0x1019   :  { %v1150_v31 = vpop.xlane.xlu1 %1149 }
0x101a   :  { %2625 = vrsqrt.f32 %v1153_v30  ;;  %v1152_v32 = vmul.f32 0.03125, %v1150_v31 }
0x101c   :  { %v1154_v33 = vadd.f32 1e-12, %v1152_v32 }
0x101e   :  { %2627 = vrsqrt.f32 %v1154_v33 }
0x1027   :  { %v2626_v34 = vpop.eup %2625 }
0x1028   :  { %v1157_v35 = vmul.f32 %v2626_v34, %v1141_v58 }
0x102a   :  { %v1165_v39 = vmul.f32 %v2209_v36, %v1157_v35 }
0x102b   :  { %v2628_v37 = vpop.eup %2627 }
0x102c   :  { %v1158_v38 = vmul.f32 %v2628_v37, %v1142_v22  ;;  %v3117_v42 = vadd.f32 %v2210_v40, %v1165_v39 }
0x102e   :  { %v1166_v41 = vmul.f32 %v2209_v36, %v1158_v38 }
0x1030   :  { %v3119_v43 = vadd.f32 %v2210_v40, %v1166_v41 }
0x1032   :  { %v1175_v44 = vpack.c.bf16 %v3119_v43, %v3117_v42 }
0x1034   :  { %2441 = vmatmul.mubr.msk.bf16.vlgmr.msra.gmra.mxu1 %vm259_vm4, %v1175_v44 }
0x1035   :  { %2446 = vmatprep.mubr.msk.bf16.mxu1 %vm2738_vm5, %v2737_v6 }
0x10f4   :  { %v1236_v45 = vpop.f32.mrf.mxu1 }
0x10f5   :  { %v1237_v49 = vadd.f32 %v2211_v46, %v1236_v45 }
0x10f6   :  { %v2442_v47 = vpop.f32.mrf.mxu1 }
0x10f8   :  { %v1239_v48 = vpop.f32.mrf.mxu1 }
0x10f9   :  { %v1240_v50 = vadd.f32 %v2211_v46, %v1239_v48 }
0x10fa   :  { %v2443_v51 = vpop.f32.mrf.mxu1 }
0x10fb   :  { %v3127_v52 = vpack.c.bf16 %v1240_v50, %v1237_v49 }
0x10fd   :  { %1358 = vrot.lane.b32.xlu1 %v3127_v52, %s2742_s9  ;;  %1245 = vrot.lane.b32.xlu0 %v3127_v52, %s2740_s5  ;;  %v3134_v53 = vrot.slane %v3127_v52, 4 }
0x1101   :  { %1356 = vrot.lane.b32.xlu1 %v3127_v52, %s2741_s13  ;;  %1474 = vrot.lane.b32.xlu0 %v3134_v53, %s2740_s5 }
0x1105   :  { %1587 = vrot.lane.b32.xlu1 %v3134_v53, %s2742_s9  ;;  %1585 = vrot.lane.b32.xlu0 %v3134_v53, %s2741_s13 }
0x116f   :  { %v1246_v54 = vpop.permute.xlu0 %1245  ;;  %v1359_v56 = vpop.permute.xlu1 %1358 }
0x1170   :  { %v1251_v55 = vsel %vm376_vm6, %v1246_v54, 0  ;;  %v1364_v59 = vsel %vm376_vm6, %v1359_v56, 0 }
0x1171   :  { %2445 = vmatpush3.bf16.xpose.msra.mxu1 %v1251_v55 }
0x1172   :  { %2456 = vmatprep.subr.bf16.mxu1 %v2737_v6 }
0x1173   :  { %v1475_v60 = vpop.permute.xlu0 %1474  ;;  %v1357_v61 = vpop.permute.xlu1 %1356 }
0x1174   :  { %v1480_v62 = vsel %vm376_vm6, %v1475_v60, 0 }
0x1177   :  { %v1588_v63 = vpop.permute.xlu1 %1587  ;;  %v1586_v1 = vpop.permute.xlu0 %1585 }
0x1178   :  { %2447 = vmatmul.mubr.msk.bf16.vlgmr.msra.gmra.mxu1 %vm376_vm6, %v3127_v52  ;;  %v1593_v0 = vsel %vm376_vm6, %v1588_v63, 0 }
0x1179   :  { %2457 = vmatpush3.bf16.xpose.msra.mxu1 %v1364_v59  ;;  %2458 = vmatprep.mubr.msk.bf16.mxu1 %vm2738_vm5, %v2737_v6 }
0x117a   :  { %2468 = vmatprep.subr.bf16.mxu1 %v2737_v6 }
0x1180   :  { %2459 = vmatmul.mubr.msk.bf16.vlgmr.msra.gmra.mxu1 %vm376_vm6, %v1357_v61 }
0x1181   :  { %2469 = vmatpush3.bf16.xpose.msra.mxu1 %v1480_v62  ;;  %2470 = vmatprep.mubr.msk.bf16.mxu1 %vm2738_vm5, %v2737_v6 }
0x1182   :  { %2480 = vmatprep.subr.bf16.mxu1 %v2737_v6 }
0x1188   :  { %2471 = vmatmul.mubr.msk.bf16.vlgmr.msra.gmra.mxu1 %vm376_vm6, %v3134_v53 }
0x1189   :  { %2481 = vmatpush3.bf16.xpose.msra.mxu1 %v1593_v0  ;;  %2482 = vmatprep.mubr.msk.bf16.mxu1 %vm2738_vm5, %v2737_v6 }
0x118a   :  { %2492 = vmatprep.subr.bf16.mxu1 %v2737_v6 }
0x1190   :  { %2483 = vmatmul.mubr.msk.bf16.vlgmr.msra.gmra.mxu1 %vm376_vm6, %v1586_v1 }
0x1191   :  { %2496 = vmatprep.mubr.msk.bf16.mxu1 %vm2738_vm5, %v2737_v6 }
0x1238   :  { %v1287_v2 = vpop.f32.mrf.mxu1 }
0x1239   :  { %v1293_v4 = vmul.f32 0.25, %v1287_v2 }
0x123a   :  { %v2448_v5 = vpop.f32.mrf.mxu1 }
0x123b   :  { %v1294_v7 = vadd.f32 %v1293_v4, %v2994_v12 }
0x123c   :  { %v1290_v8 = vpop.f32.mrf.mxu1 }
0x123d   :  { %v1295_v10 = vsel %vm429_vm7, %v1294_v7, -inf }
0x123e   :  { %1296 = vmax.xlane.f32.xlu1 %v1295_v10  ;;  %v2449_v13 = vpop.f32.mrf.mxu1 }
0x1240   :  { %v1400_v14 = vpop.f32.mrf.mxu1 }
0x1241   :  { %v1406_v15 = vmul.f32 0.25, %v1400_v14 }
0x1242   :  { %v2460_v16 = vpop.f32.mrf.mxu1 }
0x1243   :  { %v1407_v57 = vadd.f32 %v1406_v15, %v2994_v12 }
0x1244   :  { %v1403_v18 = vpop.f32.mrf.mxu1 }
0x1245   :  { %v1408_v9 = vsel %vm429_vm7, %v1407_v57, -inf }
0x1246   :  { %1409 = vmax.xlane.f32.xlu0 %v1408_v9  ;;  %v2461_v19 = vpop.f32.mrf.mxu1 }
0x1248   :  { %v1516_v20 = vpop.f32.mrf.mxu1 }
0x1249   :  { %v1522_v58 = vmul.f32 0.25, %v1516_v20 }
0x124a   :  { %v2472_v11 = vpop.f32.mrf.mxu1 }
0x124b   :  { %v1523_v17 = vadd.f32 %v1522_v58, %v3044_v3 }
0x124c   :  { %v1519_v21 = vpop.f32.mrf.mxu1 }
0x124d   :  { %v1524_v22 = vsel %vm429_vm7, %v1523_v17, -inf }
0x124e   :  { %1525 = vmax.xlane.f32.xlu0 %v1524_v22  ;;  %v2473_v23 = vpop.f32.mrf.mxu1  ;;  %v2587_v22 = vld [vmem:[%s3287_s24 + $0x8] sm:$0xff]  }
0x124f   :  { %2493 = vmatpush3.bf16.msra.mxu1 %v2587_v22 }
0x1250   :  { %v1629_v24 = vpop.f32.mrf.mxu1  ;;  %2494 = vmatprep.subr.bf16.mxu1 %v2737_v6 }
0x1251   :  { %v1635_v25 = vmul.f32 0.25, %v1629_v24  ;;  %v2588_v24 = vld [vmem:[%s3287_s24] sm:$0xff]  }
0x1252   :  { %v2484_v26 = vpop.f32.mrf.mxu1 }
0x1253   :  { %v1636_v12 = vadd.f32 %v1635_v25, %v3044_v3  ;;  %2495 = vmatpush3.bf16.msra.mxu1 %v2588_v24 }
0x1254   :  { %v1632_v27 = vpop.f32.mrf.mxu1  ;;  %2508 = vmatprep.subr.bf16.mxu1 %v2737_v6 }
0x1255   :  { %v1637_v28 = vsel %vm429_vm7, %v1636_v12, -inf }
0x1256   :  { %1638 = vmax.xlane.f32.xlu1 %v1637_v28  ;;  %v2485_v29 = vpop.f32.mrf.mxu1 }
0x12c7   :  { %v1297_v30 = vpop.xlane.xlu1 %1296 }
0x12c8   :  { %v1298_v31 = vsub.f32 %v1294_v7, %v1297_v30 }
0x12ca   :  { %v1299_v32 = vmul.f32 1.442695, %v1298_v31 }
0x12cc   :  { %2629 = vpow2.f32 %v1299_v32 }
0x12cf   :  { %v1410_v33 = vpop.xlane.xlu0 %1409 }
0x12d0   :  { %v1411_v34 = vsub.f32 %v1407_v57, %v1410_v33 }
0x12d2   :  { %v1412_v35 = vmul.f32 1.442695, %v1411_v34 }
0x12d4   :  { %2631 = vpow2.f32 %v1412_v35 }
0x12d7   :  { %v1526_v36 = vpop.xlane.xlu0 %1525 }
0x12d8   :  { %v1527_v37 = vsub.f32 %v1523_v17, %v1526_v36  ;;  %v2223_v36 = vld [vmem:[%s3288_s30] ss:$0 sm:$0xff] }
0x12d9   :  { %v2630_v38 = vpop.eup %2629 }
0x12da   :  { %v1528_v39 = vmul.f32 1.442695, %v1527_v37  ;;  %v1301_v40 = vsel %vm429_vm7, %v2630_v38, 0.0 }
0x12db   :  { %1302 = vadd.xlane.f32.xlu0 %v1301_v40 }
0x12dc   :  { %2633 = vpow2.f32 %v1528_v39 }
0x12df   :  { %v1639_v46 = vpop.xlane.xlu1 %1638 }
0x12e0   :  { %v1640_v47 = vsub.f32 %v1636_v12, %v1639_v46 }
0x12e1   :  { %v2632_v3 = vpop.eup %2631 }
0x12e2   :  { %v1414_v41 = vsel %vm429_vm7, %v2632_v3, 0.0  ;;  %v1641_v48 = vmul.f32 1.442695, %v1640_v47 }
0x12e3   :  { %1415 = vadd.xlane.f32.xlu1 %v1414_v41 }
0x12e4   :  { %2635 = vpow2.f32 %v1641_v48 }
0x12e9   :  { %v2634_v44 = vpop.eup %2633 }
0x12ea   :  { %v1530_v45 = vsel %vm429_vm7, %v2634_v44, 0.0 }
0x12eb   :  { %1531 = vadd.xlane.f32.xlu0 %v1530_v45 }
0x12f1   :  { %v2636_v49 = vpop.eup %2635 }
0x12f2   :  { %v1643_v50 = vsel %vm429_vm7, %v2636_v49, 0.0 }
0x12f4   :  { %1420 = vrot.lane.b32.xlu1 %v3127_v52, %s2743_s17 }
0x1301   :  { %1307 = vrot.lane.b32.xlu0 %v3127_v52, %s2739_s0 }
0x1305   :  { %1649 = vrot.lane.b32.xlu0 %v3134_v53, %s2743_s17 }
0x1318   :  { %1644 = vadd.xlane.f32.xlu1 %v1643_v50 }
0x1329   :  { %1536 = vrot.lane.b32.xlu1 %v3134_v53, %s2739_s0 }
0x1364   :  { %v1303_v51 = vpop.xlane.xlu0 %1302 }
0x1365   :  { %2637 = vrcp.f32 %v1303_v51 }
0x136c   :  { %v1416_v54 = vpop.xlane.xlu1 %1415 }
0x136d   :  { %2639 = vrcp.f32 %v1416_v54 }
0x1370   :  { %v1421_v61 = vpop.permute.xlu1 %1420 }
0x1371   :  { %v1426_v0 = vsel %vm178_vm0, %v1421_v61, 0 }
0x1372   :  { %v2638_v55 = vpop.eup %2637 }
0x1373   :  { %v1305_v59 = vmul.f32 %v2638_v55, %v2630_v38 }
0x1374   :  { %v1532_v56 = vpop.xlane.xlu0 %1531 }
0x1375   :  { %v1306_v62 = vpack.c.bf16 %v1305_v59, %v1305_v59  ;;  %2641 = vrcp.f32 %v1532_v56 }
0x1378   :  { %v1308_v52 = vpop.permute.xlu0 %1307 }
0x1379   :  { %v1313_v60 = vsel %vm178_vm0, %v1308_v52, 0 }
0x137a   :  { %2451 = vmatpush3.bf16.msra.mxu0 %v1313_v60  ;;  %v2640_v63 = vpop.eup %2639  ;;  %v2589_v60 = vld [vmem:[%s3289_s12 + $0x8] sm:$0xff]  }
0x137b   :  { %2462 = vmatprep.subr.bf16.mxu0 %v2737_v6  ;;  %v1418_v53 = vmul.f32 %v2640_v63, %v2632_v3 }
0x137c   :  { %v1650_v10 = vpop.permute.xlu0 %1649 }
0x137d   :  { %2453 = vmatmul.mubr.msk.bf16.vlgmr.msra.gmra.mxu0 %vm429_vm7, %v1306_v62  ;;  %v1419_v1 = vpack.c.bf16 %v1418_v53, %v1418_v53  ;;  %v1655_v14 = vsel %vm178_vm0, %v1650_v10, 0 }
0x137e   :  { %2463 = vmatpush3.bf16.msra.mxu0 %v1426_v0  ;;  %2464 = vmatprep.mubr.msk.bf16.mxu0 %vm2738_vm5, %v2737_v6 }
0x137f   :  { %2474 = vmatprep.subr.bf16.mxu0 %v2737_v6 }
0x1382   :  { %v2642_v2 = vpop.eup %2641 }
0x1383   :  { %v1534_v5 = vmul.f32 %v2642_v2, %v2634_v44 }
0x1385   :  { %2465 = vmatmul.mubr.msk.bf16.vlgmr.msra.gmra.mxu0 %vm429_vm7, %v1419_v1  ;;  %v1535_v13 = vpack.c.bf16 %v1534_v5, %v1534_v5  ;;  %v2227_v5 = vld [vmem:[%s3290_s7] ss:$0 sm:$0xff] }
0x1386   :  { %2476 = vmatprep.mubr.msk.bf16.mxu0 %vm2738_vm5, %v2737_v6 }
0x13a1   :  { %v1645_v4 = vpop.xlane.xlu1 %1644 }
0x13a2   :  { %2643 = vrcp.f32 %v1645_v4 }
0x13a5   :  { %v1537_v7 = vpop.permute.xlu1 %1536 }
0x13a6   :  { %v1542_v8 = vsel %vm178_vm0, %v1537_v7, 0 }
0x13a7   :  { %2475 = vmatpush3.bf16.msra.mxu0 %v1542_v8 }
0x13a8   :  { %2486 = vmatprep.subr.bf16.mxu0 %v2737_v6 }
0x13aa   :  { %2477 = vmatmul.mubr.msk.bf16.vlgmr.msra.gmra.mxu0 %vm429_vm7, %v1535_v13  ;;  %v2228_v13 = vld [vmem:[%s3291_s10] ss:$0 sm:$0xff] }
0x13ab   :  { %2487 = vmatpush3.bf16.msra.mxu0 %v1655_v14  ;;  %2488 = vmatprep.mubr.msk.bf16.mxu0 %vm2738_vm5, %v2737_v6 }
0x13ac   :  { %2500 = vmatprep.subr.bf16.mxu0 %v2737_v6 }
0x13af   :  { %v2644_v15 = vpop.eup %2643 }
0x13b0   :  { %v1647_v16 = vmul.f32 %v2644_v15, %v2636_v49 }
0x13b2   :  { %v1648_v57 = vpack.c.bf16 %v1647_v16, %v1647_v16 }
0x13b4   :  { %2489 = vmatmul.mubr.msk.bf16.vlgmr.msra.gmra.mxu0 %vm429_vm7, %v1648_v57 }
0x13b5   :  { %2504 = vmatprep.mubr.msk.bf16.mxu0 %vm2738_vm5, %v2737_v6  ;;  %2501 = vmatpush3.bf16.msra.mxu0 %v2589_v60 }
0x13b6   :  { %2502 = vmatprep.subr.bf16.mxu0 %v2737_v6 }
0x143d   :  { %v1349_v18 = vpop.f32.mrf.mxu0 }
0x143e   :  { %1355 = vst.msk [vmem:[#allocation2] sm:$0xff] %vm376_vm6, %v1349_v18  ;;  %v2591_v18 = vld [vmem:[%s3292_s11 + $0x18] sm:$0xff]  }
0x143f   :  { %v2454_v9 = vpop.f32.mrf.mxu0 }
0x1440   :  { %v2592_v9 = vld [vmem:[%s3292_s11 + $0x10] sm:$0xff]  }
0x1441   :  { %v1352_v19 = vpop.f32.mrf.mxu0 }
0x1442   :  { %v2593_v19 = vld [vmem:[%s3292_s11 + $0x8] sm:$0xff]  }
0x1443   :  { %v2455_v20 = vpop.f32.mrf.mxu0 }
0x1444   :  { %v2594_v20 = vld [vmem:[%s3292_s11] sm:$0xff]  }
0x1445   :  { %v1462_v58 = vpop.f32.mrf.mxu0 }
0x1446   :  { %1469 = vrot.lane.b32.xlu1 %v1462_v58, %s2744_s21  ;;  %v2229_v58 = vld [vmem:[%s3293_s15] ss:$0 sm:$0xff] }
0x1447   :  { %v2466_v11 = vpop.f32.mrf.mxu0 }
0x1449   :  { %v1465_v17 = vpop.f32.mrf.mxu0 }
0x144b   :  { %v2467_v21 = vpop.f32.mrf.mxu0 }
0x146a   :  { %v1578_v23 = vpop.f32.mrf.mxu0 }
0x146b   :  { %1584 = vst.msk [vmem:[#allocation2 + $0x8] sm:$0xff] %vm376_vm6, %v1578_v23 }
0x146c   :  { %v2478_v25 = vpop.f32.mrf.mxu0 }
0x146e   :  { %v1581_v26 = vpop.f32.mrf.mxu0 }
0x1470   :  { %v2479_v12 = vpop.f32.mrf.mxu0 }
0x1474   :  { %v1691_v27 = vpop.f32.mrf.mxu0 }
0x1475   :  { %1698 = vrot.lane.b32.xlu0 %v1691_v27, %s2744_s21 }
0x1476   :  { %v2490_v28 = vpop.f32.mrf.mxu0 }
0x1478   :  { %v1694_v29 = vpop.f32.mrf.mxu0 }
0x147a   :  { %v2491_v30 = vpop.f32.mrf.mxu0 }
0x14b8   :  { %v1470_v31 = vpop.permute.xlu1 %1469 }
0x14b9   :  { %1472 = vst.msk [vmem:[#allocation2] sm:$0xff] %vm607_vm8, %v1470_v31 }
0x14c0   :  { %v1702_v33 = vld [vmem:[#allocation2] sm:$0xff] }
0x14e7   :  { %v1699_v32 = vpop.permute.xlu0 %1698 }
0x14e8   :  { %1701 = vst.msk [vmem:[#allocation2 + $0x8] sm:$0xff] %vm607_vm8, %v1699_v32 }
0x14ef   :  { %v1703_v34 = vld [vmem:[#allocation2 + $0x8] sm:$0xff] }
0x14f0   :  { %v1704_v35 = vpack.c.bf16 %v1703_v34, %v1702_v33 }
0x14f2   :  { %2497 = vmatmul.mubr.msk.bf16.vlgmr.msra.gmra.mxu1 %vm259_vm4, %v1704_v35 }
0x14f3   :  { %2516 = vmatprep.mubr.msk.bf16.mxu1 %vm2738_vm5, %v2737_v6  ;;  %2509 = vmatpush3.bf16.msra.mxu1 %v2591_v18 }
0x14f4   :  { %2510 = vmatprep.subr.bf16.mxu1 %v2737_v6 }
0x14f7   :  { %2511 = vmatpush3.bf16.msra.mxu1 %v2592_v9 }
0x14f8   :  { %2512 = vmatprep.subr.bf16.mxu1 %v2737_v6 }
0x14fb   :  { %2513 = vmatpush3.bf16.msra.mxu1 %v2593_v19 }
0x14fc   :  { %2514 = vmatprep.subr.bf16.mxu1 %v2737_v6 }
0x14ff   :  { %2515 = vmatpush3.bf16.msra.mxu1 %v2594_v20 }
0x15b2   :  { %v1765_v37 = vpop.f32.mrf.mxu1 }
0x15b3   :  { %v1766_v38 = vadd.f32 %v2223_v36, %v1765_v37 }
0x15b4   :  { %v2498_v39 = vpop.f32.mrf.mxu1 }
0x15b5   :  { %v1772_v40 = vadd.f32 %v1766_v38, %v3117_v42 }
0x15b6   :  { %v1768_v3 = vpop.f32.mrf.mxu1 }
0x15b7   :  { %v1769_v41 = vadd.f32 %v2223_v36, %v1768_v3  ;;  %v1776_v44 = vsel %vm259_vm4, %v1772_v40, 0.0 }
0x15b8   :  { %1777 = vadd.xlane.f32.xlu1 %v1776_v44  ;;  %v2499_v45 = vpop.f32.mrf.mxu1  ;;  %v2233_v44 = vld [vmem:[%s3294_s16] ss:$0 sm:$0xff] }
0x15b9   :  { %v1773_v46 = vadd.f32 %v1769_v41, %v3119_v43  ;;  %v2590_v43 = vld [vmem:[%s3289_s12] sm:$0xff]  }
0x15ba   :  { %2503 = vmatpush3.bf16.msra.mxu0 %v2590_v43 }
0x15bb   :  { %v1779_v47 = vsel %vm259_vm4, %v1773_v46, 0.0  ;;  %2520 = vmatprep.subr.bf16.mxu0 %v2737_v6 }
0x15bc   :  { %1780 = vadd.xlane.f32.xlu0 %v1779_v47 }
0x1641   :  { %v1778_v48 = vpop.xlane.xlu1 %1777 }
0x1642   :  { %v1782_v49 = vmul.f32 0.03125, %v1778_v48 }
0x1644   :  { %v1784_v50 = vsub.f32 %v1772_v40, %v1782_v49 }
0x1645   :  { %v1781_v51 = vpop.xlane.xlu0 %1780 }
0x1646   :  { %v1783_v54 = vmul.f32 0.03125, %v1781_v51  ;;  %v1786_v55 = vmul.f32 %v1784_v50, %v1784_v50 }
0x1648   :  { %v1785_v42 = vsub.f32 %v1773_v46, %v1783_v54  ;;  %v1788_v56 = vsel %vm259_vm4, %v1786_v55, 0.0 }
0x1649   :  { %1789 = vadd.xlane.f32.xlu0 %v1788_v56 }
0x164a   :  { %v1787_v59 = vmul.f32 %v1785_v42, %v1785_v42 }
0x164c   :  { %v1791_v52 = vsel %vm259_vm4, %v1787_v59, 0.0 }
0x164d   :  { %1792 = vadd.xlane.f32.xlu1 %v1791_v52 }
0x16d2   :  { %v1790_v61 = vpop.xlane.xlu0 %1789 }
0x16d3   :  { %v1794_v62 = vmul.f32 0.03125, %v1790_v61 }
0x16d5   :  { %v1796_v63 = vadd.f32 1e-12, %v1794_v62 }
0x16d6   :  { %v1793_v0 = vpop.xlane.xlu1 %1792 }
0x16d7   :  { %2645 = vrsqrt.f32 %v1796_v63  ;;  %v1795_v53 = vmul.f32 0.03125, %v1793_v0 }
0x16d9   :  { %v1797_v1 = vadd.f32 1e-12, %v1795_v53 }
0x16db   :  { %2647 = vrsqrt.f32 %v1797_v1  ;;  %v2595_v1 = vld [vmem:[%s2907_s6 + $0x8] sm:$0xff]  }
0x16e4   :  { %v2646_v2 = vpop.eup %2645 }
0x16e5   :  { %v1800_v4 = vmul.f32 %v2646_v2, %v1784_v50  ;;  %v2596_v2 = vld [vmem:[%s2907_s6] sm:$0xff]   ;;  %s2745_s6 = smov [#allocation3]  }
0x16e6   :  { %s2116_s23 = sshll.u32 %s2745_s6, 4  ;;  %s2117_s23 = int_to_ptr.vmem [resolvable:$true] %s2116_s23 }
0x16e7   :  { %v1808_v10 = vmul.f32 %v2227_v5, %v1800_v4  ;;  %s2659_s26 = scalar_lea.vmem %s2117_s23, 256  ;;  %p2664_p1 = scmp.lt.s32.totalorder %s2117_s23, %s2117_s23 }
0x16e8   :  { %v2648_v7 = vpop.eup %2647  ;;  %p2660_p0 = scmp.ne.s32.totalorder %s2117_s23, %s2659_s26  ;;  %p2665_p2 = scmp.lt.s32.totalorder %s2659_s26, %s2659_s26 }
0x16e9   :  { %v1801_v8 = vmul.f32 %v2648_v7, %v1785_v42  ;;  %v1816_v15 = vadd.f32 %v2228_v13, %v1808_v10 }
0x16ea   :  { %p2666_p3 = por %p2665_p2, %p2664_p1 }
0x16eb   :  { %v1809_v14 = vmul.f32 %v2227_v5, %v1801_v8 }
0x16ec   :  { %p2667_p4 = pnand %p2666_p3, %p2660_p0 }
0x16ed   :  { %v1817_v16 = vadd.f32 %v2228_v13, %v1809_v14 }
0x16ef   :  { %v1818_v57 = vpack.c.bf16 %v1817_v16, %v1816_v15 }
0x16f1   :  { %2505 = vmatmul.mubr.msk.bf16.vlgmr.msra.gmra.mxu0 %vm259_vm4, %v1818_v57  ;;  %v2240_v57 = vld [vmem:[%s3296_s22] ss:$0 sm:$0xff] }
0x16f2   :  { %2524 = vmatprep.mubr.msk.bf16.mxu0 %vm2738_vm5, %v2737_v6  ;;  %2521 = vmatpush3.bf16.msra.mxu0 %v2595_v1 }
0x16f3   :  { %2522 = vmatprep.subr.bf16.mxu0 %v2737_v6 }
0x16f6   :  { %2523 = vmatpush3.bf16.msra.mxu0 %v2596_v2 }
0x17b1   :  { %v1879_v11 = vpop.f32.mrf.mxu0 }
0x17b2   :  { %v1880_v17 = vadd.f32 %v2229_v58, %v1879_v11 }
0x17b3   :  { %v2506_v21 = vpop.f32.mrf.mxu0 }
0x17b4   :  { %v1888_v22 = vmul.f32 0.044715, %v1880_v17  ;;  %v1886_v37 = vmul.f32 0.5, %v1880_v17 }
0x17b5   :  { %v1882_v23 = vpop.f32.mrf.mxu0 }
0x17b6   :  { %v1890_v24 = vmul.f32 %v1888_v22, %v1880_v17  ;;  %v1883_v25 = vadd.f32 %v2229_v58, %v1882_v23 }
0x17b7   :  { %v2507_v26 = vpop.f32.mrf.mxu0 }
0x17b8   :  { %v1892_v12 = vmul.f32 %v1890_v24, %v1880_v17  ;;  %v1889_v27 = vmul.f32 0.044715, %v1883_v25  ;;  %v1887_v38 = vmul.f32 0.5, %v1883_v25 }
0x17ba   :  { %v1894_v28 = vadd.f32 %v1892_v12, %v1880_v17  ;;  %v1891_v29 = vmul.f32 %v1889_v27, %v1883_v25 }
0x17bc   :  { %v1896_v30 = vmul.f32 0.7978846, %v1894_v28  ;;  %v1893_v31 = vmul.f32 %v1891_v29, %v1883_v25 }
0x17be   :  { %2649 = vtanh.f32 %v1896_v30  ;;  %v1895_v32 = vadd.f32 %v1893_v31, %v1883_v25 }
0x17c0   :  { %v1897_v33 = vmul.f32 0.7978846, %v1895_v32 }
0x17c2   :  { %2651 = vtanh.f32 %v1897_v33 }
0x17cb   :  { %v2650_v34 = vpop.eup %2649 }
0x17cc   :  { %v1900_v35 = vadd.f32 1.0, %v2650_v34 }
0x17ce   :  { %v1902_v40 = vmul.f32 %v1900_v35, %v1886_v37 }
0x17cf   :  { %v2652_v36 = vpop.eup %2651 }
0x17d0   :  { %v1901_v39 = vadd.f32 1.0, %v2652_v36 }
0x17d2   :  { %v1903_v3 = vmul.f32 %v1901_v39, %v1887_v38 }
0x17d4   :  { %v1904_v41 = vpack.c.bf16 %v1903_v3, %v1902_v40 }
0x17d6   :  { %2517 = vmatmul.mubr.msk.bf16.vlgmr.msra.gmra.mxu1 %vm1084_vm9, %v1904_v41 }
0x1896   :  { %v1981_v45 = vpop.f32.mrf.mxu1 }
0x1897   :  { %v1982_v46 = vadd.f32 %v2233_v44, %v1981_v45 }
0x1898   :  { %v2518_v47 = vpop.f32.mrf.mxu1 }
0x1899   :  { %v1988_v48 = vadd.f32 %v1982_v46, %v1816_v15  ;;  %v2239_v15 = vld [vmem:[%s3295_s18] ss:$0 sm:$0xff] }
0x189a   :  { %v1984_v49 = vpop.f32.mrf.mxu1 }
0x189b   :  { %v1985_v50 = vadd.f32 %v2233_v44, %v1984_v49  ;;  %v1992_v51 = vsel %vm259_vm4, %v1988_v48, 0.0 }
0x189c   :  { %1993 = vadd.xlane.f32.xlu1 %v1992_v51  ;;  %v2519_v54 = vpop.f32.mrf.mxu1 }
0x189d   :  { %v1989_v55 = vadd.f32 %v1985_v50, %v1817_v16 }
0x189f   :  { %v1995_v42 = vsel %vm259_vm4, %v1989_v55, 0.0 }
0x18a0   :  { %1996 = vadd.xlane.f32.xlu0 %v1995_v42 }
0x1925   :  { %v1994_v56 = vpop.xlane.xlu1 %1993 }
0x1926   :  { %v1998_v59 = vmul.f32 0.03125, %v1994_v56 }
0x1928   :  { %v2000_v52 = vsub.f32 %v1988_v48, %v1998_v59 }
0x1929   :  { %v1997_v60 = vpop.xlane.xlu0 %1996 }
0x192a   :  { %v1999_v43 = vmul.f32 0.03125, %v1997_v60  ;;  %v2002_v61 = vmul.f32 %v2000_v52, %v2000_v52 }
0x192c   :  { %v2001_v62 = vsub.f32 %v1989_v55, %v1999_v43  ;;  %v2004_v63 = vsel %vm259_vm4, %v2002_v61, 0.0 }
0x192d   :  { %2005 = vadd.xlane.f32.xlu1 %v2004_v63 }
0x192e   :  { %v2003_v0 = vmul.f32 %v2001_v62, %v2001_v62 }
0x1930   :  { %v2007_v53 = vsel %vm259_vm4, %v2003_v0, 0.0 }
0x1931   :  { %2008 = vadd.xlane.f32.xlu0 %v2007_v53 }
0x19b6   :  { %v2006_v4 = vpop.xlane.xlu1 %2005 }
0x19b7   :  { %v2010_v5 = vmul.f32 0.03125, %v2006_v4 }
0x19b9   :  { %v2012_v7 = vadd.f32 1e-12, %v2010_v5 }
0x19ba   :  { %v2009_v8 = vpop.xlane.xlu0 %2008 }
0x19bb   :  { %2653 = vrsqrt.f32 %v2012_v7  ;;  %v2011_v10 = vmul.f32 0.03125, %v2009_v8 }
0x19bd   :  { %v2013_v13 = vadd.f32 1e-12, %v2011_v10 }
0x19bf   :  { %2655 = vrsqrt.f32 %v2013_v13 }
0x19c8   :  { %v2654_v14 = vpop.eup %2653 }
0x19c9   :  { %v2016_v16 = vmul.f32 %v2654_v14, %v2000_v52 }
0x19cb   :  { %v2024_v18 = vmul.f32 %v2239_v15, %v2016_v16 }
0x19cc   :  { %v2656_v9 = vpop.eup %2655 }
0x19cd   :  { %v2017_v19 = vmul.f32 %v2656_v9, %v2001_v62  ;;  %v2032_v20 = vadd.f32 %v2240_v57, %v2024_v18 }
0x19cf   :  { %v2025_v58 = vmul.f32 %v2239_v15, %v2017_v19  ;;  %2034 = vst.msk [vmem:[#allocation3] sm:$0xff] %vm259_vm4, %v2032_v20 }
0x19d1   :  { %v2033_v6 = vadd.f32 %v2240_v57, %v2025_v58 }
0x19d3   :  { %v2037_v11 = vrot.slane %v2033_v6, 7  ;;  %2035 = vst.msk [vmem:[#allocation3 + $0x8] sm:$0xff] %vm259_vm4, %v2033_v6 }
0x19d5   :  { %v2040_v17 = vsel %vm2039_vm10, %v2032_v20, %v2037_v11 }
0x19d6   :  { %v2041_v21 = vpack.c.bf16 %v2040_v17, %v2040_v17 }
0x19d8   :  { %2525 = vmatmul.mubr.msk.bf16.vlgmr.msra.gmra.mxu0 %vm259_vm4, %v2041_v21 }
0x19d9   :  { %2670 = shalt.err (!%p2667_p4)
}
0x19da   :  { %s2746_s28 = smov 128   ;;  %s2747_s1 = smov 8   ;;  %v2241_v22 = vld [vmem:[%s2912_s20] ss:$0 sm:$0xff]  ;;  %vm2109_vm11 = vcmask 254976  }
0x19db   :  { %2122 = dma.vmem_to_hbm [thread:$0]  %s2117_s23, 256, %s2917_s27, [#allocation4], %s2746_s28, %s2746_s28, %s2747_s1  }
0x19dc   :  { %s2748_s2 = smov [#allocation5]  }
0x19dd   :  { %s2129_s0 = sshll.u32 %s2748_s2, 4  ;;  %s2130_s0 = int_to_ptr.vmem [resolvable:$true] %s2129_s0 }
0x19de   :  { %s2679_s5 = scalar_lea.vmem %s2130_s0, 32  ;;  %p2684_p6 = scmp.lt.s32.totalorder %s2130_s0, %s2130_s0 }
0x19df   :  { %p2680_p5 = scmp.ne.s32.totalorder %s2130_s0, %s2679_s5  ;;  %p2685_p7 = scmp.lt.s32.totalorder %s2679_s5, %s2679_s5 }
0x19e1   :  { %p2686_p8 = por %p2685_p7, %p2684_p6 }
0x19e3   :  { %p2687_p9 = pnand %p2686_p8, %p2680_p5 }
0x1a98   :  { %v2102_v23 = vpop.f32.mrf.mxu0 }
0x1a99   :  { %v2103_v24 = vadd.f32 %v2241_v22, %v2102_v23 }
0x1a9a   :  { %v2526_v25 = vpop.f32.mrf.mxu0 }
0x1a9b   :  { %2657 = vtanh.f32 %v2103_v24 }
0x1a9c   :  { %v2105_v26 = vpop.f32.mrf.mxu0 }
0x1a9e   :  { %v2527_v12 = vpop.f32.mrf.mxu0 }
0x1aa8   :  { %v2658_v27 = vpop.eup %2657 }
0x1aa9   :  { %2110 = vst.msk [vmem:[#allocation5] sm:$0x3] %vm2109_vm11, %v2658_v27 }
0x1aaa   :  { %2690 = shalt.err (!%p2687_p9)
}
0x1aab   :  { %2132 = dma.vmem_to_hbm [thread:$0]  %s2130_s0, 32, %s2922_s4, [#allocation6]  }
0x1aac   :  { %2699 = dma.done.wait [#allocation4], 256  }
0x1aad   :  { %2700 = vsyncadd [#allocation4], 4294967040 }
0x1aae   :  { %2701 = dma.done.wait [#allocation6], 32  }
0x1aaf   :  { %2702 = vsyncadd [#allocation6], 4294967264 }
0x1ab0   :  { %2139 = vsyncpa [#allocation4], 1 }
0x1ab1   :  { %2140 = vsyncpa [#allocation6], 1 }

</bundles_post_ra>
